<compile_context>
chip_gen: v7x
topology: tpu7x:2x2x1
jax: 0.10.0
libtpu: 0.0.40
codegen_flags: <defaults>
</compile_context>

<pallas_src>
import functools

import jax
import jax.numpy as jnp
from jax.experimental import pallas as pl
from jax.experimental.pallas import tpu as pltpu


LN_EPS = 1e-5          # torch.nn.LayerNorm default
LEAKY_SLOPE = 0.01     # F.leaky_relu default negative_slope
LANE = 128             # TPU lane width: output/lane dims padded to multiples of this


def _round_up(n, m):
    return ((n + m - 1) // m) * m


def _fused_mlp_kernel(*refs, num_layers, true_douts, n_pads):
    """All encoder layers fused for one batch tile.

    refs = (x, w_0..w_{L-1}, b_0..b_{L-1}, g_0..g_{L-1}, beta_0..beta_{L-1}, out)

    x:      (tb, input_dim)        bf16 input tile (true width, no lane padding)
    w_l:    (k_l, n_pad_l)         bf16 weight, (in, out) layout, zero-padded
    b/g/beta_l: (1, n_pad_l)       f32, zero-padded beyond the true out width
    out:    (tb, n_pad_last)       f32 lane-dense padded output tile

    Padding invariant: padded weight columns / bias / gamma / beta lanes are 0
    and the masked LayerNorm forces padded activation lanes back to exactly 0,
    so padded lanes never contaminate the row statistics of the next layer.
    """
    x_ref = refs[0]
    w_refs = refs[1:1 + num_layers]
    b_refs = refs[1 + num_layers:1 + 2 * num_layers]
    g_refs = refs[1 + 2 * num_layers:1 + 3 * num_layers]
    beta_refs = refs[1 + 3 * num_layers:1 + 4 * num_layers]
    o_ref = refs[1 + 4 * num_layers]

    h = x_ref[...]  # bf16

    # Static Python loop: layer count / shapes are compile-time constants, so
    # this fully unrolls inside one grid step (no HBM round-trips in between).
    for li in range(num_layers):
        d_out = true_douts[li]
        n_pad = n_pads[li]

        # Linear: bf16 x bf16 MXU matmul with f32 accumulation.
        y = jnp.dot(h, w_refs[li][...], preferred_element_type=jnp.float32)
        y = y + b_refs[li][...]

        # LayerNorm over the TRUE d_out lanes. Padded lanes of y are exactly 0,
        # so the row sum only sees real lanes; the centered value is masked so
        # the variance does too (stable two-pass formulation, no ss/d - m^2).
        inv_d = 1.0 / d_out
        mean = jnp.sum(y, axis=-1, keepdims=True) * inv_d
        c = y - mean
        if d_out != n_pad:
            lane = jax.lax.broadcasted_iota(jnp.int32, c.shape, 1)
            c = jnp.where(lane < d_out, c, 0.0)   # padded lanes -> 0 (and stay 0)
        var = jnp.sum(c * c, axis=-1, keepdims=True) * inv_d
        h = c * jax.lax.rsqrt(var + LN_EPS) * g_refs[li][...] + beta_refs[li][...]

        # LeakyReLU on all layers except the last.
        if li < num_layers - 1:
            h = jnp.where(h >= 0, h, LEAKY_SLOPE * h)
            # bf16 inter-layer activations: halves vreg/VMEM pressure and feeds
            # the native bf16 MXU of the next layer (accumulation stays f32).
            h = h.astype(jnp.bfloat16)

    o_ref[...] = h.astype(o_ref.dtype)


def _pick_batch_tile(batch):
    if batch >= 1024:
        return 256       # fills the 256-wide MXU on v6e/v7x, amortizes step overhead
    if batch >= 256:
        return 128
    if batch >= 16 and batch % 16 == 0:
        return batch // 2  # keep >=2 grid steps so v7x megacore uses both TCs
    return batch


@functools.partial(
    jax.jit, static_argnames=("feat_dims", "batch_tile", "single_buffer_params"))
def mlp_encoder_forward(x, ws, bs, gs, betas, *, feat_dims, batch_tile=None,
                        single_buffer_params=True):
    """Run the fused encoder. x: (B, input_dim) f32. Returns (B, embed_dim) f32."""
    B, input_dim = x.shape
    assert input_dim == feat_dims[0]
    num_layers = len(feat_dims) - 1
    true_douts = tuple(feat_dims[1:])
    n_pads = tuple(int(w.shape[1]) for w in ws)
    embed_dim = feat_dims[-1]
    n_last = n_pads[-1]

    # Batch tiling + padding: pad B up to a tile multiple (zero rows) instead of
    # collapsing to one full-batch tile, so pipelining / megacore sharding hold.
    tb = _pick_batch_tile(B) if batch_tile is None else batch_tile
    b_pad = _round_up(B, tb)

    # bf16 input halves x HBM traffic into the kernel; the batch pad (if any) is
    # fused with the cast so there is at most one extra pass over x.
    if b_pad != B:
        x_in = jnp.zeros((b_pad, input_dim), jnp.bfloat16).at[:B].set(
            x.astype(jnp.bfloat16))
    else:
        x_in = x.astype(jnp.bfloat16)

    def const_spec(shape):
        nd = len(shape)
        idx = lambda i: (0,) * nd
        if single_buffer_params:
            # Constant block index across the grid -> single-buffer to halve the
            # parameter VMEM footprint (matters most on v7x's 64 MiB VMEM).
            return pl.BlockSpec(shape, idx,
                                pipeline_mode=pl.Buffered(buffer_count=1))
        return pl.BlockSpec(shape, idx)

    in_specs = [pl.BlockSpec((tb, input_dim), lambda i: (i, 0))]
    in_specs += [const_spec(tuple(w.shape)) for w in ws]
    in_specs += [const_spec(tuple(b.shape)) for b in bs]
    in_specs += [const_spec(tuple(g.shape)) for g in gs]
    in_specs += [const_spec(tuple(bt.shape)) for bt in betas]

    # Advisory cost estimate so XLA can schedule neighbors around the call.
    flops = sum(2 * b_pad * int(w.shape[0]) * int(w.shape[1]) for w in ws)
    bytes_accessed = (x_in.size * 2
                      + sum(int(w.size) * 2 for w in ws)
                      + sum(int(a.size) * 4 for a in (*bs, *gs, *betas))
                      + b_pad * n_last * 4)
    cost = pl.CostEstimate(flops=flops, transcendentals=b_pad * num_layers,
                           bytes_accessed=bytes_accessed)

    # VMEM working-set estimate; only raise the scoped limit when actually needed.
    buf_mult = 1 if single_buffer_params else 2
    vmem_est = (buf_mult * (sum(int(w.size) * 2 for w in ws)
                            + sum(int(a.size) * 4 for a in (*bs, *gs, *betas)))
                + 2 * tb * input_dim * 2        # double-buffered x tiles (bf16)
                + 2 * tb * n_last * 4           # double-buffered out tiles (f32)
                + 4 * tb * max(n_pads) * 4)     # f32 activation working set
    vmem_limit = None
    if vmem_est > 24 * 1024 * 1024:
        vmem_limit = min(int(vmem_est * 3 // 2), 64 * 1024 * 1024)
    # TODO(synk): if the bf16 weight stack alone exceeds ~24 MiB (very wide hidden
    # dims), switch weights to memory_space=pl.ANY and stream them per layer with a
    # manual make_async_copy double buffer (prefetch layer li+1 under layer li's
    # matmul) instead of keeping all L layers VMEM-resident.

    kernel = functools.partial(_fused_mlp_kernel, num_layers=num_layers,
                               true_douts=true_douts, n_pads=n_pads)

    out_pad = pl.pallas_call(
        kernel,
        out_shape=jax.ShapeDtypeStruct((b_pad, n_last), jnp.float32),
        grid_spec=pltpu.PrefetchScalarGridSpec(
            num_scalar_prefetch=0,
            grid=(b_pad // tb,),
            in_specs=in_specs,
            out_specs=pl.BlockSpec((tb, n_last), lambda i: (i, 0)),
        ),
        compiler_params=pltpu.CompilerParams(
            dimension_semantics=("parallel",),
            vmem_limit_bytes=vmem_limit),
        cost_estimate=cost,
    )(x_in, *ws, *bs, *gs, *betas)

    return out_pad[:B, :embed_dim]


def init_mlp_encoder_params(key, input_dim, hidden_dim, embed_dim, num_layer):
    """Deterministic synthetic parameters matching the PyTorch module's shapes."""
    dims = [input_dim] + [hidden_dim] * (num_layer - 1) + [embed_dim]
    params = []
    for li in range(num_layer):
        din, dout = dims[li], dims[li + 1]
        key, kw, kb = jax.random.split(key, 3)
        bound = 1.0 / float(din) ** 0.5
        # nn.Linear weight is (dout, din); store transposed as (din, dout)
        w = jax.random.uniform(kw, (din, dout), jnp.float32, -bound, bound)
        b = jax.random.uniform(kb, (dout,), jnp.float32, -bound, bound)
        gamma = jnp.ones((dout,), jnp.float32)   # nn.LayerNorm weight init
        beta = jnp.zeros((dout,), jnp.float32)   # nn.LayerNorm bias init
        params.append((w, b, gamma, beta))
    return params, tuple(dims)


def pack_params(params, input_dim):
    """Per-layer zero-padded parameters (no global D_pad cube).

    Weights are bf16, (in, out) layout; the out (lane) dim is padded to a 128
    multiple, the contraction dim equals the incoming activation width
    (input_dim for layer 0, then the previous layer's padded width). Padded
    weight/bias/gamma/beta entries are zero by construction, which keeps padded
    activation lanes exactly 0 through every layer.
    """
    ws, bs, gs, betas = [], [], [], []
    k_in = input_dim
    for (w, b, g, beta) in params:
        din, dout = w.shape
        assert din <= k_in, "layer input width must fit the incoming activation"
        assert b.shape == (dout,) and g.shape == (dout,) and beta.shape == (dout,)
        n_pad = _round_up(dout, LANE)
        wp = jnp.zeros((k_in, n_pad), jnp.bfloat16).at[:din, :dout].set(
            w.astype(jnp.bfloat16))
        bp = jnp.zeros((1, n_pad), jnp.float32).at[0, :dout].set(b)
        gp = jnp.zeros((1, n_pad), jnp.float32).at[0, :dout].set(g)
        betap = jnp.zeros((1, n_pad), jnp.float32).at[0, :dout].set(beta)
        ws.append(wp); bs.append(bp); gs.append(gp); betas.append(betap)
        k_in = n_pad
    return tuple(ws), tuple(bs), tuple(gs), tuple(betas)


if __name__ == "__main__":
    # Small shapes consistent with the module: batch=16, input_dim=64,
    # hidden_dim=32, embed_dim=32, num_layer=3.
    B, INPUT_DIM, HIDDEN_DIM, EMBED_DIM, NUM_LAYER = 16, 64, 32, 32, 3

    key = jax.random.PRNGKey(0)
    key, kx = jax.random.split(key)
    x = jax.random.normal(kx, (B, INPUT_DIM), jnp.float32)

    params, feat_dims = init_mlp_encoder_params(
        key, INPUT_DIM, HIDDEN_DIM, EMBED_DIM, NUM_LAYER)
    ws, bs, gs, betas = pack_params(params, INPUT_DIM)

    try:
        out = mlp_encoder_forward(x, ws, bs, gs, betas, feat_dims=feat_dims,
                                  single_buffer_params=True)
        out = jax.block_until_ready(out)
    except Exception:
        # Fallback for jax versions where pipeline_mode=pl.Buffered(1) is not
        # supported on the top-level pallas_call grid: default double buffering.
        out = mlp_encoder_forward(x, ws, bs, gs, betas, feat_dims=feat_dims,
                                  single_buffer_params=False)
        out = jax.block_until_ready(out)

    # Pure-JAX reference mirroring the kernel's bf16 storage (weights, input,
    # inter-layer activations) with f32 math elsewhere, so the comparison is
    # apples-to-apples with the MXU path.
    ref = x.astype(jnp.bfloat16).astype(jnp.float32)
    for i, (w, b, g, beta) in enumerate(params):
        wq = w.astype(jnp.bfloat16).astype(jnp.float32)
        ref = ref @ wq + b
        m = jnp.mean(ref, axis=-1, keepdims=True)
        v = jnp.mean((ref - m) ** 2, axis=-1, keepdims=True)
        ref = (ref - m) * jax.lax.rsqrt(v + LN_EPS) * g + beta
        if i < len(params) - 1:
            ref = jnp.where(ref >= 0, ref, LEAKY_SLOPE * ref)
            ref = ref.astype(jnp.bfloat16).astype(jnp.float32)

    assert out.shape == (B, EMBED_DIM)
    err = float(jnp.max(jnp.abs(out - ref)))
    assert jnp.allclose(out, ref, atol=2e-3, rtol=2e-3), err
    print("KERNEL_OK")
</pallas_src>

<mosaic_0001>
module attributes {stable_mosaic.version = 11 : i64} {
  func.func @_fused_mlp_kernel(%arg0: i32, %arg1: memref<8x64xbf16, #tpu.memory_space<vmem>>, %arg2: memref<64x128xbf16, #tpu.memory_space<vmem>>, %arg3: memref<128x128xbf16, #tpu.memory_space<vmem>>, %arg4: memref<128x128xbf16, #tpu.memory_space<vmem>>, %arg5: memref<1x128xf32, #tpu.memory_space<vmem>>, %arg6: memref<1x128xf32, #tpu.memory_space<vmem>>, %arg7: memref<1x128xf32, #tpu.memory_space<vmem>>, %arg8: memref<1x128xf32, #tpu.memory_space<vmem>>, %arg9: memref<1x128xf32, #tpu.memory_space<vmem>>, %arg10: memref<1x128xf32, #tpu.memory_space<vmem>>, %arg11: memref<1x128xf32, #tpu.memory_space<vmem>>, %arg12: memref<1x128xf32, #tpu.memory_space<vmem>>, %arg13: memref<1x128xf32, #tpu.memory_space<vmem>>, %arg14: memref<8x128xf32, #tpu.memory_space<vmem>>) attributes {dimension_semantics = [#tpu.dimension_semantics<parallel>], iteration_bounds = array<i64: 2>, scalar_prefetch = 0 : i64, scratch_operands = 0 : i64, tpu.core_type = #tpu.core_type<tc>, window_params = [{transform_indices = @transform_0, window_bounds = array<i64: 8, 64>}, {pipeline_mode = #tpu.pipeline_mode<synchronous>, transform_indices = @transform_1, window_bounds = array<i64: 64, 128>}, {pipeline_mode = #tpu.pipeline_mode<synchronous>, transform_indices = @transform_2, window_bounds = array<i64: 128, 128>}, {pipeline_mode = #tpu.pipeline_mode<synchronous>, transform_indices = @transform_3, window_bounds = array<i64: 128, 128>}, {pipeline_mode = #tpu.pipeline_mode<synchronous>, transform_indices = @transform_4, window_bounds = array<i64: 1, 128>}, {pipeline_mode = #tpu.pipeline_mode<synchronous>, transform_indices = @transform_5, window_bounds = array<i64: 1, 128>}, {pipeline_mode = #tpu.pipeline_mode<synchronous>, transform_indices = @transform_6, window_bounds = array<i64: 1, 128>}, {pipeline_mode = #tpu.pipeline_mode<synchronous>, transform_indices = @transform_7, window_bounds = array<i64: 1, 128>}, {pipeline_mode = #tpu.pipeline_mode<synchronous>, transform_indices = @transform_8, window_bounds = array<i64: 1, 128>}, {pipeline_mode = #tpu.pipeline_mode<synchronous>, transform_indices = @transform_9, window_bounds = array<i64: 1, 128>}, {pipeline_mode = #tpu.pipeline_mode<synchronous>, transform_indices = @transform_10, window_bounds = array<i64: 1, 128>}, {pipeline_mode = #tpu.pipeline_mode<synchronous>, transform_indices = @transform_11, window_bounds = array<i64: 1, 128>}, {pipeline_mode = #tpu.pipeline_mode<synchronous>, transform_indices = @transform_12, window_bounds = array<i64: 1, 128>}, {transform_indices = @transform_13, window_bounds = array<i64: 8, 128>}]} {
    %c0 = arith.constant 0 : index
    %c0_0 = arith.constant 0 : index
    %0 = vector.load %arg1[%c0, %c0_0] : memref<8x64xbf16, #tpu.memory_space<vmem>>, vector<8x64xbf16>
    %c0_1 = arith.constant 0 : index
    %c0_2 = arith.constant 0 : index
    %1 = vector.load %arg2[%c0_1, %c0_2] : memref<64x128xbf16, #tpu.memory_space<vmem>>, vector<64x128xbf16>
    %cst = arith.constant dense<0.000000e+00> : vector<8x128xf32>
    %2 = tpu.matmul %0, %1, %cst {dimension_numbers = #tpu.dot_dimension_numbers<[1], [0], [0], [1], [0, 0, 1, 1], [], []>} : vector<8x64xbf16>, vector<64x128xbf16>, vector<8x128xf32> -> vector<8x128xf32>
    %c0_3 = arith.constant 0 : index
    %c0_4 = arith.constant 0 : index
    %3 = vector.load %arg5[%c0_3, %c0_4] : memref<1x128xf32, #tpu.memory_space<vmem>>, vector<1x128xf32>
    %4 = vector.broadcast %3 : vector<1x128xf32> to vector<8x128xf32>
    %5 = arith.addf %2, %4 : vector<8x128xf32>
    %cst_5 = arith.constant dense<0.000000e+00> : vector<8xf32>
    %6 = vector.multi_reduction <add>, %5, %cst_5 [1] : vector<8x128xf32> to vector<8xf32>
    %7 = vector.shape_cast %6 : vector<8xf32> to vector<8x1xf32>
    %cst_6 = arith.constant 3.125000e-02 : f32
    %8 = vector.broadcast %cst_6 : f32 to vector<8x1xf32>
    %9 = arith.mulf %7, %8 : vector<8x1xf32>
    %10 = vector.broadcast %9 : vector<8x1xf32> to vector<8x128xf32>
    %11 = arith.subf %5, %10 : vector<8x128xf32>
    %12 = tpu.iota {dimensions = array<i32: 1>} : vector<8x128xi32>
    %c32_i32 = arith.constant 32 : i32
    %13 = vector.broadcast %c32_i32 : i32 to vector<8x128xi32>
    %14 = arith.cmpi slt, %12, %13 : vector<8x128xi32>
    %cst_7 = arith.constant 0.000000e+00 : f32
    %15 = vector.broadcast %cst_7 : f32 to vector<8x128xf32>
    %16 = arith.select %14, %11, %15 : vector<8x128xi1>, vector<8x128xf32>
    %17 = arith.mulf %16, %16 : vector<8x128xf32>
    %cst_8 = arith.constant dense<0.000000e+00> : vector<8xf32>
    %18 = vector.multi_reduction <add>, %17, %cst_8 [1] : vector<8x128xf32> to vector<8xf32>
    %19 = vector.shape_cast %18 : vector<8xf32> to vector<8x1xf32>
    %cst_9 = arith.constant 3.125000e-02 : f32
    %20 = vector.broadcast %cst_9 : f32 to vector<8x1xf32>
    %21 = arith.mulf %19, %20 : vector<8x1xf32>
    %cst_10 = arith.constant 9.99999974E-6 : f32
    %22 = vector.broadcast %cst_10 : f32 to vector<8x1xf32>
    %23 = arith.addf %21, %22 : vector<8x1xf32>
    %24 = math.rsqrt %23 : vector<8x1xf32>
    %25 = vector.broadcast %24 : vector<8x1xf32> to vector<8x128xf32>
    %26 = arith.mulf %16, %25 : vector<8x128xf32>
    %c0_11 = arith.constant 0 : index
    %c0_12 = arith.constant 0 : index
    %27 = vector.load %arg8[%c0_11, %c0_12] : memref<1x128xf32, #tpu.memory_space<vmem>>, vector<1x128xf32>
    %28 = vector.broadcast %27 : vector<1x128xf32> to vector<8x128xf32>
    %29 = arith.mulf %26, %28 : vector<8x128xf32>
    %c0_13 = arith.constant 0 : index
    %c0_14 = arith.constant 0 : index
    %30 = vector.load %arg11[%c0_13, %c0_14] : memref<1x128xf32, #tpu.memory_space<vmem>>, vector<1x128xf32>
    %31 = vector.broadcast %30 : vector<1x128xf32> to vector<8x128xf32>
    %32 = arith.addf %29, %31 : vector<8x128xf32>
    %cst_15 = arith.constant 0.000000e+00 : f32
    %33 = vector.broadcast %cst_15 : f32 to vector<8x128xf32>
    %34 = arith.cmpf oge, %32, %33 : vector<8x128xf32>
    %cst_16 = arith.constant 0.00999999977 : f32
    %35 = vector.broadcast %cst_16 : f32 to vector<8x128xf32>
    %36 = arith.mulf %35, %32 : vector<8x128xf32>
    %37 = arith.select %34, %32, %36 : vector<8x128xi1>, vector<8x128xf32>
    %38 = arith.truncf %37 : vector<8x128xf32> to vector<8x128xbf16>
    %c0_17 = arith.constant 0 : index
    %c0_18 = arith.constant 0 : index
    %39 = vector.load %arg3[%c0_17, %c0_18] : memref<128x128xbf16, #tpu.memory_space<vmem>>, vector<128x128xbf16>
    %cst_19 = arith.constant dense<0.000000e+00> : vector<8x128xf32>
    %40 = tpu.matmul %38, %39, %cst_19 {dimension_numbers = #tpu.dot_dimension_numbers<[1], [0], [0], [1], [0, 0, 1, 1], [], []>} : vector<8x128xbf16>, vector<128x128xbf16>, vector<8x128xf32> -> vector<8x128xf32>
    %c0_20 = arith.constant 0 : index
    %c0_21 = arith.constant 0 : index
    %41 = vector.load %arg6[%c0_20, %c0_21] : memref<1x128xf32, #tpu.memory_space<vmem>>, vector<1x128xf32>
    %42 = vector.broadcast %41 : vector<1x128xf32> to vector<8x128xf32>
    %43 = arith.addf %40, %42 : vector<8x128xf32>
    %cst_22 = arith.constant dense<0.000000e+00> : vector<8xf32>
    %44 = vector.multi_reduction <add>, %43, %cst_22 [1] : vector<8x128xf32> to vector<8xf32>
    %45 = vector.shape_cast %44 : vector<8xf32> to vector<8x1xf32>
    %cst_23 = arith.constant 3.125000e-02 : f32
    %46 = vector.broadcast %cst_23 : f32 to vector<8x1xf32>
    %47 = arith.mulf %45, %46 : vector<8x1xf32>
    %48 = vector.broadcast %47 : vector<8x1xf32> to vector<8x128xf32>
    %49 = arith.subf %43, %48 : vector<8x128xf32>
    %50 = tpu.iota {dimensions = array<i32: 1>} : vector<8x128xi32>
    %c32_i32_24 = arith.constant 32 : i32
    %51 = vector.broadcast %c32_i32_24 : i32 to vector<8x128xi32>
    %52 = arith.cmpi slt, %50, %51 : vector<8x128xi32>
    %cst_25 = arith.constant 0.000000e+00 : f32
    %53 = vector.broadcast %cst_25 : f32 to vector<8x128xf32>
    %54 = arith.select %52, %49, %53 : vector<8x128xi1>, vector<8x128xf32>
    %55 = arith.mulf %54, %54 : vector<8x128xf32>
    %cst_26 = arith.constant dense<0.000000e+00> : vector<8xf32>
    %56 = vector.multi_reduction <add>, %55, %cst_26 [1] : vector<8x128xf32> to vector<8xf32>
    %57 = vector.shape_cast %56 : vector<8xf32> to vector<8x1xf32>
    %cst_27 = arith.constant 3.125000e-02 : f32
    %58 = vector.broadcast %cst_27 : f32 to vector<8x1xf32>
    %59 = arith.mulf %57, %58 : vector<8x1xf32>
    %cst_28 = arith.constant 9.99999974E-6 : f32
    %60 = vector.broadcast %cst_28 : f32 to vector<8x1xf32>
    %61 = arith.addf %59, %60 : vector<8x1xf32>
    %62 = math.rsqrt %61 : vector<8x1xf32>
    %63 = vector.broadcast %62 : vector<8x1xf32> to vector<8x128xf32>
    %64 = arith.mulf %54, %63 : vector<8x128xf32>
    %c0_29 = arith.constant 0 : index
    %c0_30 = arith.constant 0 : index
    %65 = vector.load %arg9[%c0_29, %c0_30] : memref<1x128xf32, #tpu.memory_space<vmem>>, vector<1x128xf32>
    %66 = vector.broadcast %65 : vector<1x128xf32> to vector<8x128xf32>
    %67 = arith.mulf %64, %66 : vector<8x128xf32>
    %c0_31 = arith.constant 0 : index
    %c0_32 = arith.constant 0 : index
    %68 = vector.load %arg12[%c0_31, %c0_32] : memref<1x128xf32, #tpu.memory_space<vmem>>, vector<1x128xf32>
    %69 = vector.broadcast %68 : vector<1x128xf32> to vector<8x128xf32>
    %70 = arith.addf %67, %69 : vector<8x128xf32>
    %cst_33 = arith.constant 0.000000e+00 : f32
    %71 = vector.broadcast %cst_33 : f32 to vector<8x128xf32>
    %72 = arith.cmpf oge, %70, %71 : vector<8x128xf32>
    %cst_34 = arith.constant 0.00999999977 : f32
    %73 = vector.broadcast %cst_34 : f32 to vector<8x128xf32>
    %74 = arith.mulf %73, %70 : vector<8x128xf32>
    %75 = arith.select %72, %70, %74 : vector<8x128xi1>, vector<8x128xf32>
    %76 = arith.truncf %75 : vector<8x128xf32> to vector<8x128xbf16>
    %c0_35 = arith.constant 0 : index
    %c0_36 = arith.constant 0 : index
    %77 = vector.load %arg4[%c0_35, %c0_36] : memref<128x128xbf16, #tpu.memory_space<vmem>>, vector<128x128xbf16>
    %cst_37 = arith.constant dense<0.000000e+00> : vector<8x128xf32>
    %78 = tpu.matmul %76, %77, %cst_37 {dimension_numbers = #tpu.dot_dimension_numbers<[1], [0], [0], [1], [0, 0, 1, 1], [], []>} : vector<8x128xbf16>, vector<128x128xbf16>, vector<8x128xf32> -> vector<8x128xf32>
    %c0_38 = arith.constant 0 : index
    %c0_39 = arith.constant 0 : index
    %79 = vector.load %arg7[%c0_38, %c0_39] : memref<1x128xf32, #tpu.memory_space<vmem>>, vector<1x128xf32>
    %80 = vector.broadcast %79 : vector<1x128xf32> to vector<8x128xf32>
    %81 = arith.addf %78, %80 : vector<8x128xf32>
    %cst_40 = arith.constant dense<0.000000e+00> : vector<8xf32>
    %82 = vector.multi_reduction <add>, %81, %cst_40 [1] : vector<8x128xf32> to vector<8xf32>
    %83 = vector.shape_cast %82 : vector<8xf32> to vector<8x1xf32>
    %cst_41 = arith.constant 3.125000e-02 : f32
    %84 = vector.broadcast %cst_41 : f32 to vector<8x1xf32>
    %85 = arith.mulf %83, %84 : vector<8x1xf32>
    %86 = vector.broadcast %85 : vector<8x1xf32> to vector<8x128xf32>
    %87 = arith.subf %81, %86 : vector<8x128xf32>
    %88 = tpu.iota {dimensions = array<i32: 1>} : vector<8x128xi32>
    %c32_i32_42 = arith.constant 32 : i32
    %89 = vector.broadcast %c32_i32_42 : i32 to vector<8x128xi32>
    %90 = arith.cmpi slt, %88, %89 : vector<8x128xi32>
    %cst_43 = arith.constant 0.000000e+00 : f32
    %91 = vector.broadcast %cst_43 : f32 to vector<8x128xf32>
    %92 = arith.select %90, %87, %91 : vector<8x128xi1>, vector<8x128xf32>
    %93 = arith.mulf %92, %92 : vector<8x128xf32>
    %cst_44 = arith.constant dense<0.000000e+00> : vector<8xf32>
    %94 = vector.multi_reduction <add>, %93, %cst_44 [1] : vector<8x128xf32> to vector<8xf32>
    %95 = vector.shape_cast %94 : vector<8xf32> to vector<8x1xf32>
    %cst_45 = arith.constant 3.125000e-02 : f32
    %96 = vector.broadcast %cst_45 : f32 to vector<8x1xf32>
    %97 = arith.mulf %95, %96 : vector<8x1xf32>
    %cst_46 = arith.constant 9.99999974E-6 : f32
    %98 = vector.broadcast %cst_46 : f32 to vector<8x1xf32>
    %99 = arith.addf %97, %98 : vector<8x1xf32>
    %100 = math.rsqrt %99 : vector<8x1xf32>
    %101 = vector.broadcast %100 : vector<8x1xf32> to vector<8x128xf32>
    %102 = arith.mulf %92, %101 : vector<8x128xf32>
    %c0_47 = arith.constant 0 : index
    %c0_48 = arith.constant 0 : index
    %103 = vector.load %arg10[%c0_47, %c0_48] : memref<1x128xf32, #tpu.memory_space<vmem>>, vector<1x128xf32>
    %104 = vector.broadcast %103 : vector<1x128xf32> to vector<8x128xf32>
    %105 = arith.mulf %102, %104 : vector<8x128xf32>
    %c0_49 = arith.constant 0 : index
    %c0_50 = arith.constant 0 : index
    %106 = vector.load %arg13[%c0_49, %c0_50] : memref<1x128xf32, #tpu.memory_space<vmem>>, vector<1x128xf32>
    %107 = vector.broadcast %106 : vector<1x128xf32> to vector<8x128xf32>
    %108 = arith.addf %105, %107 : vector<8x128xf32>
    %c0_51 = arith.constant 0 : index
    %c0_52 = arith.constant 0 : index
    %109 = vector.load %arg14[%c0_51, %c0_52] : memref<8x128xf32, #tpu.memory_space<vmem>>, vector<8x128xf32>
    tpu.vector_store %arg14[%c0_51, %c0_52], %108 {strides = array<i32>} : memref<8x128xf32, #tpu.memory_space<vmem>>, vector<8x128xf32>,
    return
  }
  func.func @transform_0(%arg0: i32) -> (i32, i32) {
    %c0_i32 = arith.constant 0 : i32
    %c0_i32_0 = arith.constant 0 : i32
    return %arg0, %c0_i32 : i32, i32
  }
  func.func @transform_1(%arg0: i32) -> (i32, i32) {
    %c0_i32 = arith.constant 0 : i32
    %c0_i32_0 = arith.constant 0 : i32
    %c0_i32_1 = arith.constant 0 : i32
    return %c0_i32, %c0_i32_0 : i32, i32
  }
  func.func @transform_2(%arg0: i32) -> (i32, i32) {
    %c0_i32 = arith.constant 0 : i32
    %c0_i32_0 = arith.constant 0 : i32
    %c0_i32_1 = arith.constant 0 : i32
    return %c0_i32, %c0_i32_0 : i32, i32
  }
  func.func @transform_3(%arg0: i32) -> (i32, i32) {
    %c0_i32 = arith.constant 0 : i32
    %c0_i32_0 = arith.constant 0 : i32
    %c0_i32_1 = arith.constant 0 : i32
    return %c0_i32, %c0_i32_0 : i32, i32
  }
  func.func @transform_4(%arg0: i32) -> (i32, i32) {
    %c0_i32 = arith.constant 0 : i32
    %c0_i32_0 = arith.constant 0 : i32
    %c0_i32_1 = arith.constant 0 : i32
    return %c0_i32, %c0_i32_0 : i32, i32
  }
  func.func @transform_5(%arg0: i32) -> (i32, i32) {
    %c0_i32 = arith.constant 0 : i32
    %c0_i32_0 = arith.constant 0 : i32
    %c0_i32_1 = arith.constant 0 : i32
    return %c0_i32, %c0_i32_0 : i32, i32
  }
  func.func @transform_6(%arg0: i32) -> (i32, i32) {
    %c0_i32 = arith.constant 0 : i32
    %c0_i32_0 = arith.constant 0 : i32
    %c0_i32_1 = arith.constant 0 : i32
    return %c0_i32, %c0_i32_0 : i32, i32
  }
  func.func @transform_7(%arg0: i32) -> (i32, i32) {
    %c0_i32 = arith.constant 0 : i32
    %c0_i32_0 = arith.constant 0 : i32
    %c0_i32_1 = arith.constant 0 : i32
    return %c0_i32, %c0_i32_0 : i32, i32
  }
  func.func @transform_8(%arg0: i32) -> (i32, i32) {
    %c0_i32 = arith.constant 0 : i32
    %c0_i32_0 = arith.constant 0 : i32
    %c0_i32_1 = arith.constant 0 : i32
    return %c0_i32, %c0_i32_0 : i32, i32
  }
  func.func @transform_9(%arg0: i32) -> (i32, i32) {
    %c0_i32 = arith.constant 0 : i32
    %c0_i32_0 = arith.constant 0 : i32
    %c0_i32_1 = arith.constant 0 : i32
    return %c0_i32, %c0_i32_0 : i32, i32
  }
  func.func @transform_10(%arg0: i32) -> (i32, i32) {
    %c0_i32 = arith.constant 0 : i32
    %c0_i32_0 = arith.constant 0 : i32
    %c0_i32_1 = arith.constant 0 : i32
    return %c0_i32, %c0_i32_0 : i32, i32
  }
  func.func @transform_11(%arg0: i32) -> (i32, i32) {
    %c0_i32 = arith.constant 0 : i32
    %c0_i32_0 = arith.constant 0 : i32
    %c0_i32_1 = arith.constant 0 : i32
    return %c0_i32, %c0_i32_0 : i32, i32
  }
  func.func @transform_12(%arg0: i32) -> (i32, i32) {
    %c0_i32 = arith.constant 0 : i32
    %c0_i32_0 = arith.constant 0 : i32
    %c0_i32_1 = arith.constant 0 : i32
    return %c0_i32, %c0_i32_0 : i32, i32
  }
  func.func @transform_13(%arg0: i32) -> (i32, i32) {
    %c0_i32 = arith.constant 0 : i32
    %c0_i32_0 = arith.constant 0 : i32
    return %arg0, %c0_i32 : i32, i32
  }
}

module attributes {stable_mosaic.version = 11 : i64} {
  func.func @_fused_mlp_kernel(%arg0: i32, %arg1: memref<8x64xbf16, #tpu.memory_space<vmem>>, %arg2: memref<64x128xbf16, #tpu.memory_space<vmem>>, %arg3: memref<128x128xbf16, #tpu.memory_space<vmem>>, %arg4: memref<128x128xbf16, #tpu.memory_space<vmem>>, %arg5: memref<1x128xf32, #tpu.memory_space<vmem>>, %arg6: memref<1x128xf32, #tpu.memory_space<vmem>>, %arg7: memref<1x128xf32, #tpu.memory_space<vmem>>, %arg8: memref<1x128xf32, #tpu.memory_space<vmem>>, %arg9: memref<1x128xf32, #tpu.memory_space<vmem>>, %arg10: memref<1x128xf32, #tpu.memory_space<vmem>>, %arg11: memref<1x128xf32, #tpu.memory_space<vmem>>, %arg12: memref<1x128xf32, #tpu.memory_space<vmem>>, %arg13: memref<1x128xf32, #tpu.memory_space<vmem>>, %arg14: memref<8x128xf32, #tpu.memory_space<vmem>>) attributes {dimension_semantics = [#tpu.dimension_semantics<parallel>], iteration_bounds = array<i64: 2>, scalar_prefetch = 0 : i64, scratch_operands = 0 : i64, tpu.core_type = #tpu.core_type<tc>, window_params = [{transform_indices = @transform_0, window_bounds = array<i64: 8, 64>}, {pipeline_mode = #tpu.pipeline_mode<synchronous>, transform_indices = @transform_1, window_bounds = array<i64: 64, 128>}, {pipeline_mode = #tpu.pipeline_mode<synchronous>, transform_indices = @transform_2, window_bounds = array<i64: 128, 128>}, {pipeline_mode = #tpu.pipeline_mode<synchronous>, transform_indices = @transform_3, window_bounds = array<i64: 128, 128>}, {pipeline_mode = #tpu.pipeline_mode<synchronous>, transform_indices = @transform_4, window_bounds = array<i64: 1, 128>}, {pipeline_mode = #tpu.pipeline_mode<synchronous>, transform_indices = @transform_5, window_bounds = array<i64: 1, 128>}, {pipeline_mode = #tpu.pipeline_mode<synchronous>, transform_indices = @transform_6, window_bounds = array<i64: 1, 128>}, {pipeline_mode = #tpu.pipeline_mode<synchronous>, transform_indices = @transform_7, window_bounds = array<i64: 1, 128>}, {pipeline_mode = #tpu.pipeline_mode<synchronous>, transform_indices = @transform_8, window_bounds = array<i64: 1, 128>}, {pipeline_mode = #tpu.pipeline_mode<synchronous>, transform_indices = @transform_9, window_bounds = array<i64: 1, 128>}, {pipeline_mode = #tpu.pipeline_mode<synchronous>, transform_indices = @transform_10, window_bounds = array<i64: 1, 128>}, {pipeline_mode = #tpu.pipeline_mode<synchronous>, transform_indices = @transform_11, window_bounds = array<i64: 1, 128>}, {pipeline_mode = #tpu.pipeline_mode<synchronous>, transform_indices = @transform_12, window_bounds = array<i64: 1, 128>}, {transform_indices = @transform_13, window_bounds = array<i64: 8, 128>}]} {
    %c0 = arith.constant 0 : index
    %c0_0 = arith.constant 0 : index
    %0 = vector.load %arg1[%c0, %c0_0] : memref<8x64xbf16, #tpu.memory_space<vmem>>, vector<8x64xbf16>
    %c0_1 = arith.constant 0 : index
    %c0_2 = arith.constant 0 : index
    %1 = vector.load %arg2[%c0_1, %c0_2] : memref<64x128xbf16, #tpu.memory_space<vmem>>, vector<64x128xbf16>
    %cst = arith.constant dense<0.000000e+00> : vector<8x128xf32>
    %2 = tpu.matmul %0, %1, %cst {dimension_numbers = #tpu.dot_dimension_numbers<[1], [0], [0], [1], [0, 0, 1, 1], [], []>} : vector<8x64xbf16>, vector<64x128xbf16>, vector<8x128xf32> -> vector<8x128xf32>
    %c0_3 = arith.constant 0 : index
    %c0_4 = arith.constant 0 : index
    %3 = vector.load %arg5[%c0_3, %c0_4] : memref<1x128xf32, #tpu.memory_space<vmem>>, vector<1x128xf32>
    %4 = vector.broadcast %3 : vector<1x128xf32> to vector<8x128xf32>
    %5 = arith.addf %2, %4 : vector<8x128xf32>
    %cst_5 = arith.constant dense<0.000000e+00> : vector<8xf32>
    %6 = vector.multi_reduction <add>, %5, %cst_5 [1] : vector<8x128xf32> to vector<8xf32>
    %7 = vector.shape_cast %6 : vector<8xf32> to vector<8x1xf32>
    %cst_6 = arith.constant 3.125000e-02 : f32
    %8 = vector.broadcast %cst_6 : f32 to vector<8x1xf32>
    %9 = arith.mulf %7, %8 : vector<8x1xf32>
    %10 = vector.broadcast %9 : vector<8x1xf32> to vector<8x128xf32>
    %11 = arith.subf %5, %10 : vector<8x128xf32>
    %12 = tpu.iota {dimensions = array<i32: 1>} : vector<8x128xi32>
    %c32_i32 = arith.constant 32 : i32
    %13 = vector.broadcast %c32_i32 : i32 to vector<8x128xi32>
    %14 = arith.cmpi slt, %12, %13 : vector<8x128xi32>
    %cst_7 = arith.constant 0.000000e+00 : f32
    %15 = vector.broadcast %cst_7 : f32 to vector<8x128xf32>
    %16 = arith.select %14, %11, %15 : vector<8x128xi1>, vector<8x128xf32>
    %17 = arith.mulf %16, %16 : vector<8x128xf32>
    %cst_8 = arith.constant dense<0.000000e+00> : vector<8xf32>
    %18 = vector.multi_reduction <add>, %17, %cst_8 [1] : vector<8x128xf32> to vector<8xf32>
    %19 = vector.shape_cast %18 : vector<8xf32> to vector<8x1xf32>
    %cst_9 = arith.constant 3.125000e-02 : f32
    %20 = vector.broadcast %cst_9 : f32 to vector<8x1xf32>
    %21 = arith.mulf %19, %20 : vector<8x1xf32>
    %cst_10 = arith.constant 9.99999974E-6 : f32
    %22 = vector.broadcast %cst_10 : f32 to vector<8x1xf32>
    %23 = arith.addf %21, %22 : vector<8x1xf32>
    %24 = math.rsqrt %23 : vector<8x1xf32>
    %25 = vector.broadcast %24 : vector<8x1xf32> to vector<8x128xf32>
    %26 = arith.mulf %16, %25 : vector<8x128xf32>
    %c0_11 = arith.constant 0 : index
    %c0_12 = arith.constant 0 : index
    %27 = vector.load %arg8[%c0_11, %c0_12] : memref<1x128xf32, #tpu.memory_space<vmem>>, vector<1x128xf32>
    %28 = vector.broadcast %27 : vector<1x128xf32> to vector<8x128xf32>
    %29 = arith.mulf %26, %28 : vector<8x128xf32>
    %c0_13 = arith.constant 0 : index
    %c0_14 = arith.constant 0 : index
    %30 = vector.load %arg11[%c0_13, %c0_14] : memref<1x128xf32, #tpu.memory_space<vmem>>, vector<1x128xf32>
    %31 = vector.broadcast %30 : vector<1x128xf32> to vector<8x128xf32>
    %32 = arith.addf %29, %31 : vector<8x128xf32>
    %cst_15 = arith.constant 0.000000e+00 : f32
    %33 = vector.broadcast %cst_15 : f32 to vector<8x128xf32>
    %34 = arith.cmpf oge, %32, %33 : vector<8x128xf32>
    %cst_16 = arith.constant 0.00999999977 : f32
    %35 = vector.broadcast %cst_16 : f32 to vector<8x128xf32>
    %36 = arith.mulf %35, %32 : vector<8x128xf32>
    %37 = arith.select %34, %32, %36 : vector<8x128xi1>, vector<8x128xf32>
    %38 = arith.truncf %37 : vector<8x128xf32> to vector<8x128xbf16>
    %c0_17 = arith.constant 0 : index
    %c0_18 = arith.constant 0 : index
    %39 = vector.load %arg3[%c0_17, %c0_18] : memref<128x128xbf16, #tpu.memory_space<vmem>>, vector<128x128xbf16>
    %cst_19 = arith.constant dense<0.000000e+00> : vector<8x128xf32>
    %40 = tpu.matmul %38, %39, %cst_19 {dimension_numbers = #tpu.dot_dimension_numbers<[1], [0], [0], [1], [0, 0, 1, 1], [], []>} : vector<8x128xbf16>, vector<128x128xbf16>, vector<8x128xf32> -> vector<8x128xf32>
    %c0_20 = arith.constant 0 : index
    %c0_21 = arith.constant 0 : index
    %41 = vector.load %arg6[%c0_20, %c0_21] : memref<1x128xf32, #tpu.memory_space<vmem>>, vector<1x128xf32>
    %42 = vector.broadcast %41 : vector<1x128xf32> to vector<8x128xf32>
    %43 = arith.addf %40, %42 : vector<8x128xf32>
    %cst_22 = arith.constant dense<0.000000e+00> : vector<8xf32>
    %44 = vector.multi_reduction <add>, %43, %cst_22 [1] : vector<8x128xf32> to vector<8xf32>
    %45 = vector.shape_cast %44 : vector<8xf32> to vector<8x1xf32>
    %cst_23 = arith.constant 3.125000e-02 : f32
    %46 = vector.broadcast %cst_23 : f32 to vector<8x1xf32>
    %47 = arith.mulf %45, %46 : vector<8x1xf32>
    %48 = vector.broadcast %47 : vector<8x1xf32> to vector<8x128xf32>
    %49 = arith.subf %43, %48 : vector<8x128xf32>
    %50 = tpu.iota {dimensions = array<i32: 1>} : vector<8x128xi32>
    %c32_i32_24 = arith.constant 32 : i32
    %51 = vector.broadcast %c32_i32_24 : i32 to vector<8x128xi32>
    %52 = arith.cmpi slt, %50, %51 : vector<8x128xi32>
    %cst_25 = arith.constant 0.000000e+00 : f32
    %53 = vector.broadcast %cst_25 : f32 to vector<8x128xf32>
    %54 = arith.select %52, %49, %53 : vector<8x128xi1>, vector<8x128xf32>
    %55 = arith.mulf %54, %54 : vector<8x128xf32>
    %cst_26 = arith.constant dense<0.000000e+00> : vector<8xf32>
    %56 = vector.multi_reduction <add>, %55, %cst_26 [1] : vector<8x128xf32> to vector<8xf32>
    %57 = vector.shape_cast %56 : vector<8xf32> to vector<8x1xf32>
    %cst_27 = arith.constant 3.125000e-02 : f32
    %58 = vector.broadcast %cst_27 : f32 to vector<8x1xf32>
    %59 = arith.mulf %57, %58 : vector<8x1xf32>
    %cst_28 = arith.constant 9.99999974E-6 : f32
    %60 = vector.broadcast %cst_28 : f32 to vector<8x1xf32>
    %61 = arith.addf %59, %60 : vector<8x1xf32>
    %62 = math.rsqrt %61 : vector<8x1xf32>
    %63 = vector.broadcast %62 : vector<8x1xf32> to vector<8x128xf32>
    %64 = arith.mulf %54, %63 : vector<8x128xf32>
    %c0_29 = arith.constant 0 : index
    %c0_30 = arith.constant 0 : index
    %65 = vector.load %arg9[%c0_29, %c0_30] : memref<1x128xf32, #tpu.memory_space<vmem>>, vector<1x128xf32>
    %66 = vector.broadcast %65 : vector<1x128xf32> to vector<8x128xf32>
    %67 = arith.mulf %64, %66 : vector<8x128xf32>
    %c0_31 = arith.constant 0 : index
    %c0_32 = arith.constant 0 : index
    %68 = vector.load %arg12[%c0_31, %c0_32] : memref<1x128xf32, #tpu.memory_space<vmem>>, vector<1x128xf32>
    %69 = vector.broadcast %68 : vector<1x128xf32> to vector<8x128xf32>
    %70 = arith.addf %67, %69 : vector<8x128xf32>
    %cst_33 = arith.constant 0.000000e+00 : f32
    %71 = vector.broadcast %cst_33 : f32 to vector<8x128xf32>
    %72 = arith.cmpf oge, %70, %71 : vector<8x128xf32>
    %cst_34 = arith.constant 0.00999999977 : f32
    %73 = vector.broadcast %cst_34 : f32 to vector<8x128xf32>
    %74 = arith.mulf %73, %70 : vector<8x128xf32>
    %75 = arith.select %72, %70, %74 : vector<8x128xi1>, vector<8x128xf32>
    %76 = arith.truncf %75 : vector<8x128xf32> to vector<8x128xbf16>
    %c0_35 = arith.constant 0 : index
    %c0_36 = arith.constant 0 : index
    %77 = vector.load %arg4[%c0_35, %c0_36] : memref<128x128xbf16, #tpu.memory_space<vmem>>, vector<128x128xbf16>
    %cst_37 = arith.constant dense<0.000000e+00> : vector<8x128xf32>
    %78 = tpu.matmul %76, %77, %cst_37 {dimension_numbers = #tpu.dot_dimension_numbers<[1], [0], [0], [1], [0, 0, 1, 1], [], []>} : vector<8x128xbf16>, vector<128x128xbf16>, vector<8x128xf32> -> vector<8x128xf32>
    %c0_38 = arith.constant 0 : index
    %c0_39 = arith.constant 0 : index
    %79 = vector.load %arg7[%c0_38, %c0_39] : memref<1x128xf32, #tpu.memory_space<vmem>>, vector<1x128xf32>
    %80 = vector.broadcast %79 : vector<1x128xf32> to vector<8x128xf32>
    %81 = arith.addf %78, %80 : vector<8x128xf32>
    %cst_40 = arith.constant dense<0.000000e+00> : vector<8xf32>
    %82 = vector.multi_reduction <add>, %81, %cst_40 [1] : vector<8x128xf32> to vector<8xf32>
    %83 = vector.shape_cast %82 : vector<8xf32> to vector<8x1xf32>
    %cst_41 = arith.constant 3.125000e-02 : f32
    %84 = vector.broadcast %cst_41 : f32 to vector<8x1xf32>
    %85 = arith.mulf %83, %84 : vector<8x1xf32>
    %86 = vector.broadcast %85 : vector<8x1xf32> to vector<8x128xf32>
    %87 = arith.subf %81, %86 : vector<8x128xf32>
    %88 = tpu.iota {dimensions = array<i32: 1>} : vector<8x128xi32>
    %c32_i32_42 = arith.constant 32 : i32
    %89 = vector.broadcast %c32_i32_42 : i32 to vector<8x128xi32>
    %90 = arith.cmpi slt, %88, %89 : vector<8x128xi32>
    %cst_43 = arith.constant 0.000000e+00 : f32
    %91 = vector.broadcast %cst_43 : f32 to vector<8x128xf32>
    %92 = arith.select %90, %87, %91 : vector<8x128xi1>, vector<8x128xf32>
    %93 = arith.mulf %92, %92 : vector<8x128xf32>
    %cst_44 = arith.constant dense<0.000000e+00> : vector<8xf32>
    %94 = vector.multi_reduction <add>, %93, %cst_44 [1] : vector<8x128xf32> to vector<8xf32>
    %95 = vector.shape_cast %94 : vector<8xf32> to vector<8x1xf32>
    %cst_45 = arith.constant 3.125000e-02 : f32
    %96 = vector.broadcast %cst_45 : f32 to vector<8x1xf32>
    %97 = arith.mulf %95, %96 : vector<8x1xf32>
    %cst_46 = arith.constant 9.99999974E-6 : f32
    %98 = vector.broadcast %cst_46 : f32 to vector<8x1xf32>
    %99 = arith.addf %97, %98 : vector<8x1xf32>
    %100 = math.rsqrt %99 : vector<8x1xf32>
    %101 = vector.broadcast %100 : vector<8x1xf32> to vector<8x128xf32>
    %102 = arith.mulf %92, %101 : vector<8x128xf32>
    %c0_47 = arith.constant 0 : index
    %c0_48 = arith.constant 0 : index
    %103 = vector.load %arg10[%c0_47, %c0_48] : memref<1x128xf32, #tpu.memory_space<vmem>>, vector<1x128xf32>
    %104 = vector.broadcast %103 : vector<1x128xf32> to vector<8x128xf32>
    %105 = arith.mulf %102, %104 : vector<8x128xf32>
    %c0_49 = arith.constant 0 : index
    %c0_50 = arith.constant 0 : index
    %106 = vector.load %arg13[%c0_49, %c0_50] : memref<1x128xf32, #tpu.memory_space<vmem>>, vector<1x128xf32>
    %107 = vector.broadcast %106 : vector<1x128xf32> to vector<8x128xf32>
    %108 = arith.addf %105, %107 : vector<8x128xf32>
    %c0_51 = arith.constant 0 : index
    %c0_52 = arith.constant 0 : index
    %109 = vector.load %arg14[%c0_51, %c0_52] : memref<8x128xf32, #tpu.memory_space<vmem>>, vector<8x128xf32>
    tpu.vector_store %arg14[%c0_51, %c0_52], %108 {strides = array<i32>} : memref<8x128xf32, #tpu.memory_space<vmem>>, vector<8x128xf32>,
    return
  }
  func.func @transform_0(%arg0: i32) -> (i32, i32) {
    %c0_i32 = arith.constant 0 : i32
    %c0_i32_0 = arith.constant 0 : i32
    return %arg0, %c0_i32 : i32, i32
  }
  func.func @transform_1(%arg0: i32) -> (i32, i32) {
    %c0_i32 = arith.constant 0 : i32
    %c0_i32_0 = arith.constant 0 : i32
    %c0_i32_1 = arith.constant 0 : i32
    return %c0_i32, %c0_i32_0 : i32, i32
  }
  func.func @transform_2(%arg0: i32) -> (i32, i32) {
    %c0_i32 = arith.constant 0 : i32
    %c0_i32_0 = arith.constant 0 : i32
    %c0_i32_1 = arith.constant 0 : i32
    return %c0_i32, %c0_i32_0 : i32, i32
  }
  func.func @transform_3(%arg0: i32) -> (i32, i32) {
    %c0_i32 = arith.constant 0 : i32
    %c0_i32_0 = arith.constant 0 : i32
    %c0_i32_1 = arith.constant 0 : i32
    return %c0_i32, %c0_i32_0 : i32, i32
  }
  func.func @transform_4(%arg0: i32) -> (i32, i32) {
    %c0_i32 = arith.constant 0 : i32
    %c0_i32_0 = arith.constant 0 : i32
    %c0_i32_1 = arith.constant 0 : i32
    return %c0_i32, %c0_i32_0 : i32, i32
  }
  func.func @transform_5(%arg0: i32) -> (i32, i32) {
    %c0_i32 = arith.constant 0 : i32
    %c0_i32_0 = arith.constant 0 : i32
    %c0_i32_1 = arith.constant 0 : i32
    return %c0_i32, %c0_i32_0 : i32, i32
  }
  func.func @transform_6(%arg0: i32) -> (i32, i32) {
    %c0_i32 = arith.constant 0 : i32
    %c0_i32_0 = arith.constant 0 : i32
    %c0_i32_1 = arith.constant 0 : i32
    return %c0_i32, %c0_i32_0 : i32, i32
  }
  func.func @transform_7(%arg0: i32) -> (i32, i32) {
    %c0_i32 = arith.constant 0 : i32
    %c0_i32_0 = arith.constant 0 : i32
    %c0_i32_1 = arith.constant 0 : i32
    return %c0_i32, %c0_i32_0 : i32, i32
  }
  func.func @transform_8(%arg0: i32) -> (i32, i32) {
    %c0_i32 = arith.constant 0 : i32
    %c0_i32_0 = arith.constant 0 : i32
    %c0_i32_1 = arith.constant 0 : i32
    return %c0_i32, %c0_i32_0 : i32, i32
  }
  func.func @transform_9(%arg0: i32) -> (i32, i32) {
    %c0_i32 = arith.constant 0 : i32
    %c0_i32_0 = arith.constant 0 : i32
    %c0_i32_1 = arith.constant 0 : i32
    return %c0_i32, %c0_i32_0 : i32, i32
  }
  func.func @transform_10(%arg0: i32) -> (i32, i32) {
    %c0_i32 = arith.constant 0 : i32
    %c0_i32_0 = arith.constant 0 : i32
    %c0_i32_1 = arith.constant 0 : i32
    return %c0_i32, %c0_i32_0 : i32, i32
  }
  func.func @transform_11(%arg0: i32) -> (i32, i32) {
    %c0_i32 = arith.constant 0 : i32
    %c0_i32_0 = arith.constant 0 : i32
    %c0_i32_1 = arith.constant 0 : i32
    return %c0_i32, %c0_i32_0 : i32, i32
  }
  func.func @transform_12(%arg0: i32) -> (i32, i32) {
    %c0_i32 = arith.constant 0 : i32
    %c0_i32_0 = arith.constant 0 : i32
    %c0_i32_1 = arith.constant 0 : i32
    return %c0_i32, %c0_i32_0 : i32, i32
  }
  func.func @transform_13(%arg0: i32) -> (i32, i32) {
    %c0_i32 = arith.constant 0 : i32
    %c0_i32_0 = arith.constant 0 : i32
    return %arg0, %c0_i32 : i32, i32
  }
}

</mosaic_0001>

<bundles_post_ra>
// kernel: mlp_encoder_forward.1
= control target key start
LH: loop header
LB: loop body
LE: loop exit
PB: predicated region body
PF: predicated region fallthrough
CT: control target
= control target key end

     0   :  { %s1713_s0 = inlined_call_operand.vmem [shape: bf16[16,64], index: 0, kind: input, shape index: {}]   ;;  %s1714_s1 = inlined_call_operand.hbm [shape: bf16[64,128], index: 1, kind: input, shape index: {}]   ;;  %s1715_s2 = inlined_call_operand.hbm [shape: bf16[128,128], index: 2, kind: input, shape index: {}]   ;;  %s1716_s3 = inlined_call_operand.hbm [shape: bf16[128,128], index: 3, kind: input, shape index: {}]   ;;  %s1717_s4 = inlined_call_operand.vmem [shape: f32[1,128], index: 4, kind: input, shape index: {}]   ;;  %s1718_s5 = inlined_call_operand.vmem [shape: f32[1,128], index: 5, kind: input, shape index: {}]   ;;  %s1719_s6 = inlined_call_operand.vmem [shape: f32[1,128], index: 6, kind: input, shape index: {}]   ;;  %s1720_s7 = inlined_call_operand.vmem [shape: f32[1,128], index: 7, kind: input, shape index: {}]   ;;  %s1721_s8 = inlined_call_operand.vmem [shape: f32[1,128], index: 8, kind: input, shape index: {}]   ;;  %s1722_s9 = inlined_call_operand.vmem [shape: f32[1,128], index: 9, kind: input, shape index: {}]   ;;  %s1723_s10 = inlined_call_operand.vmem [shape: f32[1,128], index: 10, kind: input, shape index: {}]   ;;  %s1724_s11 = inlined_call_operand.vmem [shape: f32[1,128], index: 11, kind: input, shape index: {}]   ;;  %s1725_s12 = inlined_call_operand.vmem [shape: f32[1,128], index: 12, kind: input, shape index: {}]   ;;  %s1726_s13 = inlined_call_operand.hbm [shape: f32[16,128], index: 13, kind: output, shape index: {}]  }
   0x1   :  { %1737 = sst [smem:[#allocation18_spill]] %s1722_s9 }
   0x2   :  { %1738 = sst [smem:[#allocation19_spill]] %s1725_s12 }
   0x3   :  { %1739 = sst [smem:[#allocation20_spill]] %s1726_s13 }
   0x4   :  { %18 = vsyncpa [#allocation3], 0 }
   0x5   :  { %19 = vsyncpa [#allocation6], 0 }
   0x6   :  { %20 = vsyncpa [#allocation4], 0 }
   0x7   :  { %22 = vsyncpa [#allocation4 + $0x1], 0  ;;  %s1442_s25 = smov 0   ;;  %s1444_s26 = smov 0  }
   0x8   :  { %s1446_s27 = smov 0   ;;  %s1448_s28 = smov 0  }
   0x9 LB: > { %1740 = sst [smem:[#allocation12_spill]] %s1350_s25  ;;  %s1463_s29 = sadd.s32 4294967295, %s1362_s28   ;;  %s1362_s28 = sphi %s1448_s28, %s1764_s28   ;;  %s1358_s27 = sphi %s1446_s27, %s1766_s27   ;;  %s1354_s26 = sphi %s1444_s26, %s1768_s26   ;;  %s1350_s25 = sphi %s1442_s25, %s1767_s25  }
   0xa   : > { %1741 = sst [smem:[#allocation13_spill]] %s1358_s27  ;;  %s987_s30 = sadd.s32 4294967294, %s1362_s28  }
   0xb   : > { %1742 = sst [smem:[#allocation14_spill]] %s1362_s28  ;;  %s1467_s14 = sadd.s32 1, %s1362_s28  }
   0xc   : > { %1743 = sst [smem:[#allocation15_spill]] %s1467_s14  ;;  %s313_s15 = sadd.s32 1, %s1358_s27 }
   0xd   : > { %s310_s16 = ssub.s32 %s1362_s28, %s1467_s14  ;;  %p323_p0 = scmp.ne.s32.totalorder %s1358_s27, %s1354_s26 }
   0xe   : > { %p311_p1 = scmp.eq.s32.totalorder %s310_s16, 0  ;;  %p324_p2 = scmp.eq.s32.totalorder %s1463_s29, 1 }
   0xf   : > { %p329_p3 = scmp.ne.s32.totalorder %s1354_s26, %s1350_s25  ;;  %p330_p4 = scmp.eq.s32.totalorder %s987_s30, 1 }
  0x10   : > { %s1478_s17 = scalar_select %p311_p1, %s1358_s27, %s313_s15  }
  0x11   : > { %p1480_p5 = por %p324_p2, %p323_p0  ;;  %p1484_p6 = por %p330_p4, %p329_p3 }
  0x12   : > { %1744 = sst [smem:[#allocation16_spill]] %s1478_s17  ;;  %p988_p7 = scmp.ge.s32.totalorder %s1362_s28, 1 }
  0x13   : > { %s1745_s18 = scalar_select %p1480_p5, 1, 0 }
  0x14   : > { %s1746_s19 = scalar_select %p1484_p6, 1, 0 }
  0x15   : > { %p337_p8 = scmp.lt.s32.totalorder %s1362_s28, 3  ;;  %p1732_p9 = scmp.eq.s32.totalorder %s1463_s29, 0 }
  0x16   : > { %1747 = sst [smem:[#allocation17_spill]] %s1746_s19  ;;  %s1364_s21 = smov [#allocation5]  }
  0x17   : > { %p1491_p10 = pnand %p988_p7, %p337_p8  ;;  %s362_s22 = sshll.u32 %s1364_s21, 4  ;;  %s1497_s22 = int_to_ptr.vmem [resolvable:$true] %s362_s22 }
  0x18   : > { %s1365_s24 = smov [#allocation2]   ;;  %s1366_s15 = smov [#allocation7]  }
  0x19   : > { %s1748_s20 = scalar_select %p1491_p10, 1, 0 }
  0x1a   : > { %p1122_p11 = pneg %p1491_p10  ;;  %s349_s30 = sshll.u32 %s1365_s24, 4  ;;  %s1505_s30 = int_to_ptr.vmem [resolvable:$true] %s349_s30 }
  0x1b   : > { %s1507_s16 = sshll.u32 %s1366_s15, 4  ;;  %s1208_s14 = scalar_lea.hbm %s1715_s2, 1024  ;;  %s376_s16 = int_to_ptr.vmem [resolvable:$true] %s1507_s16 }
  0x1c   : > { %p1501_p12 = pnand %p1732_p9, %p1122_p11  ;;  %p1209_p13 = scmp.ne.s32.totalorder %s1715_s2, %s1208_s14 }
  0x1d   : > { %p1215_p3 = scmp.lt.u32.totalorder %s1208_s14, %s1715_s2 }
  0x1e   : > { %p1517_p0 = pneg %p1501_p12 }
  0x20   : > { %p1211_p1 = pnand %p1517_p0, %p1209_p13 }
  0x22   : > { %p1212_p2 = pneg %p1211_p1 }
  0x24   : > { %p1217_p4 = pnand %p1215_p3, %p1212_p2 }
  0x26   : > { %1220 = shalt.err (!%p1217_p4)
}
  0x27   : > { %s1221_s27 = scalar_lea.vmem %s1497_s22, 1024  ;;  %p1229_p9 = scmp.lt.s32.totalorder %s1497_s22, %s1497_s22 }
  0x28   : > { %p1222_p7 = scmp.ne.s32.totalorder %s1497_s22, %s1221_s27  ;;  %p1230_p6 = scmp.lt.s32.totalorder %s1221_s27, %s1221_s27 }
  0x2a   : > { %p1224_p8 = pnand %p1222_p7, %p1517_p0  ;;  %p1231_p13 = por %p1230_p6, %p1229_p9 }
  0x2c   : > { %p1225_p11 = pneg %p1224_p8 }
  0x2e   : > { %p1232_p1 = pnand %p1231_p13, %p1225_p11 }
  0x30   : > { %1235 = shalt.err (!%p1232_p1)
}
  0x31   : > { %s1367_s17 = smov 64   ;;  %s1368_s14 = smov 4  }
  0x32   : > { %1128 = dma.hbm_to_vmem [thread:$0]  (!%p1501_p12), %s1715_s2, 1024, %s1497_s22, [#allocation6], %s1367_s17, %s1367_s17, %s1368_s14  }
  0x33   : > { %s1236_s27 = scalar_lea.hbm %s1714_s1, 512 }
  0x34   : > { %p1237_p6 = scmp.ne.s32.totalorder %s1714_s1, %s1236_s27  ;;  %p1243_p3 = scmp.lt.u32.totalorder %s1236_s27, %s1714_s1 }
  0x36   : > { %p1239_p9 = pnand %p1237_p6, %p1517_p0 }
  0x38   : > { %p1240_p2 = pneg %p1239_p9 }
  0x3a   : > { %p1245_p4 = pnand %p1243_p3, %p1240_p2 }
  0x3c   : > { %1248 = shalt.err (!%p1245_p4)
}
  0x3d   : > { %s1249_s22 = scalar_lea.vmem %s1505_s30, 512  ;;  %p1257_p13 = scmp.lt.s32.totalorder %s1505_s30, %s1505_s30 }
  0x3e   : > { %p1250_p7 = scmp.ne.s32.totalorder %s1505_s30, %s1249_s22  ;;  %p1258_p1 = scmp.lt.s32.totalorder %s1249_s22, %s1249_s22 }
  0x40   : > { %p1252_p8 = pnand %p1250_p7, %p1517_p0  ;;  %p1259_p6 = por %p1258_p1, %p1257_p13 }
  0x42   : > { %p1253_p11 = pneg %p1252_p8 }
  0x44   : > { %p1260_p9 = pnand %p1259_p6, %p1253_p11 }
  0x46   : > { %1263 = shalt.err (!%p1260_p9)
}
  0x47   : > { %1125 = dma.hbm_to_vmem [thread:$0]  (!%p1501_p12), %s1714_s1, 512, %s1505_s30, [#allocation3], %s1367_s17, %s1367_s17, %s1368_s14  }
  0x48   : > { %s1264_s19 = scalar_lea.hbm %s1716_s3, 1024 }
  0x49   : > { %p1265_p2 = scmp.ne.s32.totalorder %s1716_s3, %s1264_s19  ;;  %p1271_p7 = scmp.lt.u32.totalorder %s1264_s19, %s1716_s3 }
  0x4b   : > { %p1267_p3 = pnand %p1265_p2, %p1517_p0 }
  0x4d   : > { %p1268_p4 = pneg %p1267_p3 }
  0x4f   : > { %p1273_p8 = pnand %p1271_p7, %p1268_p4 }
  0x51   : > { %1276 = shalt.err (!%p1273_p8)
}
  0x52   : > { %s1277_s22 = scalar_lea.vmem %s376_s16, 1024  ;;  %p1285_p6 = scmp.lt.s32.totalorder %s376_s16, %s376_s16 }
  0x53   : > { %p1278_p11 = scmp.ne.s32.totalorder %s376_s16, %s1277_s22  ;;  %p1286_p9 = scmp.lt.s32.totalorder %s1277_s22, %s1277_s22 }
  0x55   : > { %p1280_p13 = pnand %p1278_p11, %p1517_p0  ;;  %p1287_p5 = por %p1286_p9, %p1285_p6 }
  0x57   : > { %p1281_p1 = pneg %p1280_p13 }
  0x59   : > { %p1288_p10 = pnand %p1287_p5, %p1281_p1 }
  0x5b   : > { %1291 = shalt.err (!%p1288_p10)
}
  0x5c   : > { %1131 = dma.hbm_to_vmem [thread:$0]  (!%p1501_p12), %s1716_s3, 1024, %s376_s16, [#allocation6], %s1367_s17, %s1367_s17, %s1368_s14  }
  0x5d   : > { %p1751_p2 = scmp.ne.s32.totalorder %s1748_s20, 0 }
  0x5e   : > { %p1752_p0 = scmp.eq.s32.totalorder (!%p1751_p2), %s1463_s29, 0 }
  0x5f   : > { %425 = sbr.rel (%p1751_p2) target bundleno = 1726 (0x6be), region = 72 }
  0x66   : > { %1337 = dma.done.wait (%p1752_p0), [#allocation3], 512   ;;  %p1753_p3 = pmov %p1752_p0 }
  0x67   : > { %p1754_p5 = pmov %p1752_p0 }
  0x68   : > { %1339 = vsyncadd (%p1753_p3), [#allocation3], 4294966784 }
  0x69   : > { %1341 = dma.done.wait (%p1754_p5), [#allocation6], 2048   ;;  %p1755_p10 = pmov %p1752_p0 }
  0x6a   : > { %v1369_v0 = vmov 0.0   ;;  %vm1370_vm0 = vmmov 0   ;;  %p476_p12 = scmp.lt.s32.totalorder %s1463_s29, 1  ;;  %v1182_v1 = vld [vmem:[#allocation2] sm:$0xff]   ;;  %v1183_v2 = vld [vmem:[#allocation2 + $0x8] sm:$0xff]   ;;  %v1184_v3 = vld [vmem:[#allocation2 + $0x10] sm:$0xff]   ;;  %v569_v14 = vlaneseq }
  0x6b   : > { %1343 = vsyncadd (%p1755_p10), [#allocation6], 4294965248  ;;  %1056 = vmatprep.subr.bf16.mxu0 %v1369_v0  ;;  %1064 = vmatprep.mubr.msk.bf16.mxu0 %vm1370_vm0, %v1369_v0  ;;  %vm521_vm1 = vcmask 523264   ;;  %v1185_v4 = vld [vmem:[#allocation2 + $0x18] sm:$0xff]   ;;  %v1186_v12 = vld [vmem:[#allocation5] sm:$0xff]   ;;  %s473_s23 = sand.u32 1, %s1354_s26  }
  0x6c   : > { %1068 = vmatprep.subr.bf16.mxu1 %v1369_v0  ;;  %1084 = vmatprep.mubr.msk.bf16.mxu1 %vm1370_vm0, %v1369_v0  ;;  %s477_s25 = scalar_select %p476_p12, %s1463_s29, 1  ;;  %v999_v6 = vld [vmem:[%s1717_s4] ss:$0 sm:$0xff]  ;;  %v1187_v13 = vld [vmem:[#allocation5 + $0x8] sm:$0xff]   ;;  %v1621_v15 = vand.u32 127, %v569_v14  ;;  %v1188_v21 = vld [vmem:[#allocation5 + $0x10] sm:$0xff]  }
  0x6d   : > { %1057 = vmatpush3.bf16.msra.mxu0 %v1182_v1  ;;  %1069 = vmatpush3.bf16.msra.mxu1 %v1186_v12  ;;  %v1189_v22 = vld [vmem:[#allocation5 + $0x18] sm:$0xff]   ;;  %v1190_v23 = vld [vmem:[#allocation5 + $0x20] sm:$0xff]   ;;  %v1191_v24 = vld [vmem:[#allocation5 + $0x28] sm:$0xff]   ;;  %s997_s16 = sshll.u32 %s473_s23, 3  ;;  %s1756_s12 = sld [smem:[#allocation18_spill]] }
  0x6e   : > { %1058 = vmatprep.subr.bf16.mxu0 %v1369_v0  ;;  %s998_s20 = sshll.u32 %s477_s25, 2  ;;  %1070 = vmatprep.subr.bf16.mxu1 %v1369_v0  ;;  %vm571_vm2 = vcmp.lt.s32.totalorder %v1621_v15, 32  ;;  %v1192_v25 = vld [vmem:[#allocation5 + $0x30] sm:$0xff]   ;;  %v1193_v26 = vld [vmem:[#allocation5 + $0x38] sm:$0xff]   ;;  %v1194_v45 = vld [vmem:[#allocation7] sm:$0xff]   ;;  %s1757_s19 = sld [smem:[#allocation19_spill]] }
  0x6f   : > { %s479_s17 = scalar_lea.vmem %s1713_s0, %s998_s20  ;;  %v1005_v31 = vld [vmem:[%s1720_s7] ss:$0 sm:$0xff]  ;;  %v1195_v46 = vld [vmem:[#allocation7 + $0x8] sm:$0xff]   ;;  %v1196_v52 = vld [vmem:[#allocation7 + $0x10] sm:$0xff]   ;;  %s1030_s21 = sshll.u32 %s1463_s29, 7 }
  0x70   : > { %v481_v5 = vld [vmem:[%s479_s17] sm:$0xf]  ;;  %v1198_v54 = vld [vmem:[#allocation7 + $0x20] sm:$0xff]   ;;  %v1199_v55 = vld [vmem:[#allocation7 + $0x28] sm:$0xff]   ;;  %s475_s24 = scalar_lea.vmem [#allocation8], %s997_s16  ;;  %s1758_s30 = sld [smem:[#allocation20_spill]] }
  0x71   : > { %1059 = vmatpush3.bf16.msra.mxu0 %v1183_v2  ;;  %1071 = vmatpush3.bf16.msra.mxu1 %v1187_v13  ;;  %v1006_v33 = vld [vmem:[%s1723_s10] ss:$0 sm:$0xff]  ;;  %v1200_v56 = vld [vmem:[#allocation7 + $0x30] sm:$0xff]   ;;  %s897_s15 = sshll.u32 %s475_s24, 4  ;;  %s884_s25 = scalar_lea.sflag [#allocation4], %s473_s23  ;;  %s1673_s15 = int_to_ptr.vmem [resolvable:$true] %s897_s15 }
  0x72   : > { %1060 = vmatprep.subr.bf16.mxu0 %v1369_v0  ;;  %1072 = vmatprep.subr.bf16.mxu1 %v1369_v0  ;;  %v1007_v39 = vld [vmem:[%s1718_s5] ss:$0 sm:$0xff]  ;;  %s1292_s20 = scalar_lea.vmem %s1673_s15, 128  ;;  %p1759_p7 = scmp.ne.s32.totalorder %s1745_s18, 0 }
  0x73   : > { %v1197_v53 = vld [vmem:[#allocation7 + $0x18] sm:$0xff]   ;;  %p1293_p4 = scmp.ne.s32.totalorder %s1673_s15, %s1292_s20  ;;  %s1371_s29 = smov [#allocation8]  }
  0x74   : > { %v1201_v57 = vld [vmem:[#allocation7 + $0x38] sm:$0xff]   ;;  %s1296_s16 = sshll.u32 %s1371_s29, 4  ;;  %s1297_s16 = int_to_ptr.vmem [resolvable:$false] %s1296_s16 }
  0x75   : > { %1061 = vmatpush3.bf16.msra.mxu0 %v1184_v3  ;;  %1073 = vmatpush3.bf16.msra.mxu1 %v1188_v21  ;;  %v1016_v62 = vld [vmem:[%s1721_s8] ss:$0 sm:$0xff]  ;;  %p1294_p8 = pnand %p1293_p4, %p1759_p7  ;;  %s1298_s17 = scalar_lea.vmem %s1297_s16, 256 }
  0x76   : > { %1062 = vmatprep.subr.bf16.mxu0 %v1369_v0  ;;  %1074 = vmatprep.subr.bf16.mxu1 %v1369_v0  ;;  %v1017_v1 = vld [vmem:[%s1724_s11] ss:$0 sm:$0xff]  ;;  %s1671_s9 = scalar_lea.hbm %s1758_s30, %s1030_s21  ;;  %p1299_p13 = scmp.lt.s32.totalorder %s1673_s15, %s1297_s16 }
  0x77   : > { %v1028_v15 = vld [vmem:[%s1757_s19] ss:$0 sm:$0xff]  ;;  %p1295_p11 = pneg %p1294_p8  ;;  %p1300_p1 = scmp.lt.s32.totalorder %s1298_s17, %s1292_s20 }
  0x79   : > { %1063 = vmatpush3.bf16.msra.mxu0 %v1185_v4  ;;  %1075 = vmatpush3.bf16.msra.mxu1 %v1189_v22  ;;  %v1027_v22 = vld [vmem:[%s1756_s12] ss:$0 sm:$0xff]  ;;  %p1301_p6 = por %p1300_p1, %p1299_p13 }
  0x7a   : > { %1088 = vmatprep.subr.bf16.mxu0 %v1369_v0  ;;  %1076 = vmatprep.subr.bf16.mxu1 %v1369_v0 }
  0x7b   : > { %p1302_p9 = pnand %p1301_p6, %p1295_p11 }
  0x7c   : > { %1065 = vmatmul.mubr.msk.bf16.vlgmr.msra.gmra.mrb[0].mxu0 %vm521_vm1, %v481_v5 }
  0x7d   : > { %1104 = vmatprep.mubr.msk.bf16.mxu0 %vm1370_vm0, %v1369_v0  ;;  %1077 = vmatpush3.bf16.msra.mxu1 %v1190_v23 }
  0x7e   : > { %1078 = vmatprep.subr.bf16.mxu1 %v1369_v0  ;;  %1089 = vmatpush3.bf16.msra.mxu0 %v1194_v45 }
  0x7f   : > { %1090 = vmatprep.subr.bf16.mxu0 %v1369_v0 }
  0x81   : > { %1079 = vmatpush3.bf16.msra.mxu1 %v1191_v24 }
  0x82   : > { %1080 = vmatprep.subr.bf16.mxu1 %v1369_v0  ;;  %1091 = vmatpush3.bf16.msra.mxu0 %v1195_v46 }
  0x83   : > { %1092 = vmatprep.subr.bf16.mxu0 %v1369_v0 }
  0x85   : > { %1081 = vmatpush3.bf16.msra.mxu1 %v1192_v25 }
  0x86   : > { %1082 = vmatprep.subr.bf16.mxu1 %v1369_v0  ;;  %1093 = vmatpush3.bf16.msra.mxu0 %v1196_v52 }
  0x87   : > { %1094 = vmatprep.subr.bf16.mxu0 %v1369_v0 }
  0x89   : > { %1083 = vmatpush3.bf16.msra.mxu1 %v1193_v26 }
  0x8a   : > { %1095 = vmatpush3.bf16.msra.mxu0 %v1197_v53 }
  0x8b   : > { %1096 = vmatprep.subr.bf16.mxu0 %v1369_v0 }
  0x8e   : > { %1097 = vmatpush3.bf16.msra.mxu0 %v1198_v54 }
  0x8f   : > { %1098 = vmatprep.subr.bf16.mxu0 %v1369_v0 }
  0x92   : > { %1099 = vmatpush3.bf16.msra.mxu0 %v1199_v55 }
  0x93   : > { %1100 = vmatprep.subr.bf16.mxu0 %v1369_v0 }
  0x96   : > { %1101 = vmatpush3.bf16.msra.mxu0 %v1200_v56 }
  0x97   : > { %1102 = vmatprep.subr.bf16.mxu0 %v1369_v0 }
  0x9a   : > { %1103 = vmatpush3.bf16.msra.mxu0 %v1201_v57 }
 0x14f   : > { %v559_v7 = vpop.f32.mrb[0].mxu0 }
 0x150   : > { %v560_v8 = vadd.f32 %v999_v6, %v559_v7  ;;  %v1066_v9 = vpop.f32.mrb[1].mxu0  ;;  %v1018_v6 = vld [vmem:[%s1719_s6] ss:$0 sm:$0xff] }
 0x151   : > { %v562_v10 = vpop.f32.mrb[2].mxu0 }
 0x152   : > { %565 = vadd.xlane.f32.xlu0 %v560_v8  ;;  %v1067_v11 = vpop.f32.mrb[3].mxu0 }
 0x1df   : > { %v566_v16 = vpop.xlane.xlu0 %565 }
 0x1e0   : > { %v567_v17 = vmul.f32 0.03125, %v566_v16 }
 0x1e2   : > { %v568_v18 = vsub.f32 %v560_v8, %v567_v17 }
 0x1e4   : > { %v572_v19 = vsel %vm571_vm2, %v568_v18, 0.0 }
 0x1e5   : > { %v573_v20 = vmul.f32 %v572_v19, %v572_v19 }
 0x1e7   : > { %574 = vadd.xlane.f32.xlu0 %v573_v20 }
 0x274   : > { %v575_v27 = vpop.xlane.xlu0 %574 }
 0x275   : > { %v576_v28 = vmul.f32 0.03125, %v575_v27 }
 0x277   : > { %v577_v29 = vadd.f32 1e-05, %v576_v28 }
 0x279   : > { %1202 = vrsqrt.f32 %v577_v29 }
 0x283   : > { %v1203_v30 = vpop.eup %1202 }
 0x284   : > { %v579_v32 = vmul.f32 %v1203_v30, %v572_v19 }
 0x286   : > { %v587_v34 = vmul.f32 %v1005_v31, %v579_v32 }
 0x288   : > { %v595_v35 = vadd.f32 %v1006_v33, %v587_v34 }
 0x28a   : > { %vm596_vm3 = vcmp.ge.f32.partialorder %v595_v35, 0.0  ;;  %v597_v36 = vmul.f32 0.01, %v595_v35 }
 0x28c   : > { %v598_v37 = vsel %vm596_vm3, %v595_v35, %v597_v36 }
 0x28d   : > { %v599_v38 = vpack.c.bf16 %v598_v37, %v598_v37 }
 0x28f   : > { %1085 = vmatmul.mubr.bf16.vlgmr.msra.gmra.mrb[0].mxu1 %v599_v38 }
 0x362   : > { %v705_v40 = vpop.f32.mrb[0].mxu1 }
 0x363   : > { %v706_v41 = vadd.f32 %v1007_v39, %v705_v40  ;;  %v1086_v42 = vpop.f32.mrb[1].mxu1 }
 0x364   : > { %v708_v43 = vpop.f32.mrb[2].mxu1 }
 0x365   : > { %711 = vadd.xlane.f32.xlu1 %v706_v41  ;;  %v1087_v44 = vpop.f32.mrb[3].mxu1 }
 0x3f2   : > { %v712_v47 = vpop.xlane.xlu1 %711 }
 0x3f3   : > { %v713_v48 = vmul.f32 0.03125, %v712_v47 }
 0x3f5   : > { %v714_v49 = vsub.f32 %v706_v41, %v713_v48 }
 0x3f7   : > { %v715_v50 = vsel %vm571_vm2, %v714_v49, 0.0 }
 0x3f8   : > { %v716_v51 = vmul.f32 %v715_v50, %v715_v50 }
 0x3fa   : > { %717 = vadd.xlane.f32.xlu1 %v716_v51 }
 0x487   : > { %v718_v58 = vpop.xlane.xlu1 %717 }
 0x488   : > { %v719_v59 = vmul.f32 0.03125, %v718_v58 }
 0x48a   : > { %v720_v60 = vadd.f32 1e-05, %v719_v59 }
 0x48c   : > { %1204 = vrsqrt.f32 %v720_v60 }
 0x496   : > { %v1205_v61 = vpop.eup %1204 }
 0x497   : > { %v722_v63 = vmul.f32 %v1205_v61, %v715_v50 }
 0x499   : > { %v730_v2 = vmul.f32 %v1016_v62, %v722_v63 }
 0x49b   : > { %v738_v3 = vadd.f32 %v1017_v1, %v730_v2 }
 0x49d   : > { %vm739_vm4 = vcmp.ge.f32.partialorder %v738_v3, 0.0  ;;  %v740_v4 = vmul.f32 0.01, %v738_v3 }
 0x49f   : > { %v741_v0 = vsel %vm739_vm4, %v738_v3, %v740_v4 }
 0x4a0   : > { %v742_v5 = vpack.c.bf16 %v741_v0, %v741_v0 }
 0x4a2   : > { %1105 = vmatmul.mubr.bf16.vlgmr.msra.gmra.mrb[4].mxu0 %v742_v5 }
 0x575   : > { %v848_v7 = vpop.f32.mrb[4].mxu0 }
 0x576   : > { %v849_v8 = vadd.f32 %v1018_v6, %v848_v7  ;;  %v1106_v9 = vpop.f32.mrb[5].mxu0 }
 0x577   : > { %v851_v10 = vpop.f32.mrb[6].mxu0 }
 0x578   : > { %854 = vadd.xlane.f32.xlu0 %v849_v8  ;;  %v1107_v11 = vpop.f32.mrb[7].mxu0 }
 0x605   : > { %v855_v12 = vpop.xlane.xlu0 %854 }
 0x606   : > { %v856_v13 = vmul.f32 0.03125, %v855_v12 }
 0x608   : > { %v857_v14 = vsub.f32 %v849_v8, %v856_v13 }
 0x60a   : > { %v858_v16 = vsel %vm571_vm2, %v857_v14, 0.0 }
 0x60b   : > { %v859_v17 = vmul.f32 %v858_v16, %v858_v16 }
 0x60d   : > { %860 = vadd.xlane.f32.xlu1 %v859_v17 }
 0x69a   : > { %v861_v18 = vpop.xlane.xlu1 %860 }
 0x69b   : > { %v862_v19 = vmul.f32 0.03125, %v861_v18 }
 0x69d   : > { %v863_v20 = vadd.f32 1e-05, %v862_v19 }
 0x69f   : > { %1206 = vrsqrt.f32 %v863_v20 }
 0x6a9   : > { %v1207_v21 = vpop.eup %1206 }
 0x6aa   : > { %v865_v23 = vmul.f32 %v1207_v21, %v858_v16 }
 0x6ac   : > { %v873_v24 = vmul.f32 %v1027_v22, %v865_v23 }
 0x6ae   : > { %v881_v25 = vadd.f32 %v1028_v15, %v873_v24 }
 0x6b0   : > { %882 = vst [vmem:[%s475_s24] sm:$0xff] %v881_v25 }
 0x6b1   : > { %1305 = shalt.err (!%p1302_p9)
}
 0x6b2   : > { %s1306_s23 = scalar_lea.hbm %s1671_s9, 128  ;;  %s1310_s13 = scalar_lea.hbm %s1758_s30, 256 }
 0x6b3   : > { %p1307_p2 = scmp.ne.s32.totalorder %s1671_s9, %s1306_s23  ;;  %p1311_p5 = scmp.lt.u32.totalorder %s1671_s9, %s1758_s30 }
 0x6b4   : > { %p1312_p10 = scmp.lt.u32.totalorder %s1310_s13, %s1306_s23  ;;  %p1314_p4 = scmp.lt.u32.totalorder %s1306_s23, %s1671_s9 }
 0x6b5   : > { %p1308_p0 = pnand %p1307_p2, %p1759_p7 }
 0x6b6   : > { %p1313_p12 = por %p1312_p10, %p1311_p5 }
 0x6b7   : > { %p1309_p3 = pneg %p1308_p0 }
 0x6b8   : > { %p1315_p8 = por %p1314_p4, %p1313_p12 }
 0x6ba   : > { %p1316_p11 = pnand %p1315_p8, %p1309_p3 }
 0x6bc   : > { %1319 = shalt.err (!%p1316_p11)
}
 0x6bd   : > { %1120 = dma.vmem_to_hbm [thread:$0]  (%p1759_p7), %s1673_s15, 128, %s1671_s9, %s884_s25  }
 0x6be PF: > { %s1760_s21 = sld [smem:[#allocation14_spill]]  ;;  %s1761_s24 = sld [smem:[#allocation12_spill]] }
 0x6bf   : > { %s1762_s27 = sld [smem:[#allocation17_spill]] }
 0x6c4   : > { %p1142_p13 = scmp.ge.s32.totalorder %s1760_s21, 2  ;;  %s909_s22 = sand.u32 1, %s1761_s24  }
 0x6c5   : > { %p1763_p1 = scmp.ne.s32.totalorder %s1762_s27, 0  ;;  %s910_s20 = scalar_lea.sflag [#allocation4], %s909_s22 }
 0x6c7   : > { %p1133_p6 = pnand %p1142_p13, %p1763_p1 }
 0x6c9   : > { %1345 = dma.done.wait (!%p1133_p6), %s910_s20, 128  }
 0x6ca   : > { %1347 = vsyncadd (!%p1133_p6), %s910_s20, 4294967168  ;;  %s1764_s28 = sld [smem:[#allocation15_spill]]  ;;  %s1765_s29 = sld [smem:[#allocation13_spill]] }
 0x6cb   : > { %s1766_s27 = sld [smem:[#allocation16_spill]]  ;;  %s1767_s25 = smov %s1354_s26 }
 0x6d0   : > { %p25_p9 = scmp.ge.s32.totalorder %s1764_s28, 4   ;;  %s1768_s26 = smov %s1765_s29 }
 0x6d2   :  { %27 = sbr.rel (!%p25_p9) target bundleno = 9 (0x9), region = 120 }
 0x6d9   :  { %915 = vsyncpa [#allocation3], 1 }
 0x6da   :  { %917 = vsyncpa [#allocation3 + $0x1], 1 }
 0x6db   :  { %918 = vsyncpa [#allocation6], 1 }
 0x6dc   :  { %919 = vsyncpa [#allocation4], 1 }
 0x6dd   :  { %921 = vsyncpa [#allocation4 + $0x1], 1 }

// kernel: mlp_encoder_forward.1
= control target key start
LH: loop header
LB: loop body
LE: loop exit
PB: predicated region body
PF: predicated region fallthrough
CT: control target
= control target key end

     0   :  { %s1713_s0 = inlined_call_operand.vmem [shape: bf16[16,64], index: 0, kind: input, shape index: {}]   ;;  %s1714_s1 = inlined_call_operand.hbm [shape: bf16[64,128], index: 1, kind: input, shape index: {}]   ;;  %s1715_s2 = inlined_call_operand.hbm [shape: bf16[128,128], index: 2, kind: input, shape index: {}]   ;;  %s1716_s3 = inlined_call_operand.hbm [shape: bf16[128,128], index: 3, kind: input, shape index: {}]   ;;  %s1717_s4 = inlined_call_operand.vmem [shape: f32[1,128], index: 4, kind: input, shape index: {}]   ;;  %s1718_s5 = inlined_call_operand.vmem [shape: f32[1,128], index: 5, kind: input, shape index: {}]   ;;  %s1719_s6 = inlined_call_operand.vmem [shape: f32[1,128], index: 6, kind: input, shape index: {}]   ;;  %s1720_s7 = inlined_call_operand.vmem [shape: f32[1,128], index: 7, kind: input, shape index: {}]   ;;  %s1721_s8 = inlined_call_operand.vmem [shape: f32[1,128], index: 8, kind: input, shape index: {}]   ;;  %s1722_s9 = inlined_call_operand.vmem [shape: f32[1,128], index: 9, kind: input, shape index: {}]   ;;  %s1723_s10 = inlined_call_operand.vmem [shape: f32[1,128], index: 10, kind: input, shape index: {}]   ;;  %s1724_s11 = inlined_call_operand.vmem [shape: f32[1,128], index: 11, kind: input, shape index: {}]   ;;  %s1725_s12 = inlined_call_operand.vmem [shape: f32[1,128], index: 12, kind: input, shape index: {}]   ;;  %s1726_s13 = inlined_call_operand.hbm [shape: f32[16,128], index: 13, kind: output, shape index: {}]  }
   0x1   :  { %1737 = sst [smem:[#allocation18_spill]] %s1722_s9 }
   0x2   :  { %1738 = sst [smem:[#allocation19_spill]] %s1725_s12 }
   0x3   :  { %1739 = sst [smem:[#allocation20_spill]] %s1726_s13 }
   0x4   :  { %18 = vsyncpa [#allocation3], 0 }
   0x5   :  { %19 = vsyncpa [#allocation6], 0 }
   0x6   :  { %20 = vsyncpa [#allocation4], 0 }
   0x7   :  { %22 = vsyncpa [#allocation4 + $0x1], 0  ;;  %s1442_s25 = smov 0   ;;  %s1444_s26 = smov 0  }
   0x8   :  { %s1446_s27 = smov 0   ;;  %s1448_s28 = smov 0  }
   0x9 LB: > { %1740 = sst [smem:[#allocation12_spill]] %s1350_s25  ;;  %s1463_s29 = sadd.s32 4294967295, %s1362_s28   ;;  %s1362_s28 = sphi %s1448_s28, %s1764_s28   ;;  %s1358_s27 = sphi %s1446_s27, %s1766_s27   ;;  %s1354_s26 = sphi %s1444_s26, %s1768_s26   ;;  %s1350_s25 = sphi %s1442_s25, %s1767_s25  }
   0xa   : > { %1741 = sst [smem:[#allocation13_spill]] %s1358_s27  ;;  %s987_s30 = sadd.s32 4294967294, %s1362_s28  }
   0xb   : > { %1742 = sst [smem:[#allocation14_spill]] %s1362_s28  ;;  %s1467_s14 = sadd.s32 1, %s1362_s28  }
   0xc   : > { %1743 = sst [smem:[#allocation15_spill]] %s1467_s14  ;;  %s313_s15 = sadd.s32 1, %s1358_s27 }
   0xd   : > { %s310_s16 = ssub.s32 %s1362_s28, %s1467_s14  ;;  %p323_p0 = scmp.ne.s32.totalorder %s1358_s27, %s1354_s26 }
   0xe   : > { %p311_p1 = scmp.eq.s32.totalorder %s310_s16, 0  ;;  %p324_p2 = scmp.eq.s32.totalorder %s1463_s29, 1 }
   0xf   : > { %p329_p3 = scmp.ne.s32.totalorder %s1354_s26, %s1350_s25  ;;  %p330_p4 = scmp.eq.s32.totalorder %s987_s30, 1 }
  0x10   : > { %s1478_s17 = scalar_select %p311_p1, %s1358_s27, %s313_s15  }
  0x11   : > { %p1480_p5 = por %p324_p2, %p323_p0  ;;  %p1484_p6 = por %p330_p4, %p329_p3 }
  0x12   : > { %1744 = sst [smem:[#allocation16_spill]] %s1478_s17  ;;  %p988_p7 = scmp.ge.s32.totalorder %s1362_s28, 1 }
  0x13   : > { %s1745_s18 = scalar_select %p1480_p5, 1, 0 }
  0x14   : > { %s1746_s19 = scalar_select %p1484_p6, 1, 0 }
  0x15   : > { %p337_p8 = scmp.lt.s32.totalorder %s1362_s28, 3  ;;  %p1732_p9 = scmp.eq.s32.totalorder %s1463_s29, 0 }
  0x16   : > { %1747 = sst [smem:[#allocation17_spill]] %s1746_s19  ;;  %s1364_s21 = smov [#allocation5]  }
  0x17   : > { %p1491_p10 = pnand %p988_p7, %p337_p8  ;;  %s362_s22 = sshll.u32 %s1364_s21, 4  ;;  %s1497_s22 = int_to_ptr.vmem [resolvable:$true] %s362_s22 }
  0x18   : > { %s1365_s24 = smov [#allocation2]   ;;  %s1366_s15 = smov [#allocation7]  }
  0x19   : > { %s1748_s20 = scalar_select %p1491_p10, 1, 0 }
  0x1a   : > { %p1122_p11 = pneg %p1491_p10  ;;  %s349_s30 = sshll.u32 %s1365_s24, 4  ;;  %s1505_s30 = int_to_ptr.vmem [resolvable:$true] %s349_s30 }
  0x1b   : > { %s1507_s16 = sshll.u32 %s1366_s15, 4  ;;  %s1208_s14 = scalar_lea.hbm %s1715_s2, 1024  ;;  %s376_s16 = int_to_ptr.vmem [resolvable:$true] %s1507_s16 }
  0x1c   : > { %p1501_p12 = pnand %p1732_p9, %p1122_p11  ;;  %p1209_p13 = scmp.ne.s32.totalorder %s1715_s2, %s1208_s14 }
  0x1d   : > { %p1215_p3 = scmp.lt.u32.totalorder %s1208_s14, %s1715_s2 }
  0x1e   : > { %p1517_p0 = pneg %p1501_p12 }
  0x20   : > { %p1211_p1 = pnand %p1517_p0, %p1209_p13 }
  0x22   : > { %p1212_p2 = pneg %p1211_p1 }
  0x24   : > { %p1217_p4 = pnand %p1215_p3, %p1212_p2 }
  0x26   : > { %1220 = shalt.err (!%p1217_p4)
}
  0x27   : > { %s1221_s27 = scalar_lea.vmem %s1497_s22, 1024  ;;  %p1229_p9 = scmp.lt.s32.totalorder %s1497_s22, %s1497_s22 }
  0x28   : > { %p1222_p7 = scmp.ne.s32.totalorder %s1497_s22, %s1221_s27  ;;  %p1230_p6 = scmp.lt.s32.totalorder %s1221_s27, %s1221_s27 }
  0x2a   : > { %p1224_p8 = pnand %p1222_p7, %p1517_p0  ;;  %p1231_p13 = por %p1230_p6, %p1229_p9 }
  0x2c   : > { %p1225_p11 = pneg %p1224_p8 }
  0x2e   : > { %p1232_p1 = pnand %p1231_p13, %p1225_p11 }
  0x30   : > { %1235 = shalt.err (!%p1232_p1)
}
  0x31   : > { %s1367_s17 = smov 64   ;;  %s1368_s14 = smov 4  }
  0x32   : > { %1128 = dma.hbm_to_vmem [thread:$0]  (!%p1501_p12), %s1715_s2, 1024, %s1497_s22, [#allocation6], %s1367_s17, %s1367_s17, %s1368_s14  }
  0x33   : > { %s1236_s27 = scalar_lea.hbm %s1714_s1, 512 }
  0x34   : > { %p1237_p6 = scmp.ne.s32.totalorder %s1714_s1, %s1236_s27  ;;  %p1243_p3 = scmp.lt.u32.totalorder %s1236_s27, %s1714_s1 }
  0x36   : > { %p1239_p9 = pnand %p1237_p6, %p1517_p0 }
  0x38   : > { %p1240_p2 = pneg %p1239_p9 }
  0x3a   : > { %p1245_p4 = pnand %p1243_p3, %p1240_p2 }
  0x3c   : > { %1248 = shalt.err (!%p1245_p4)
}
  0x3d   : > { %s1249_s22 = scalar_lea.vmem %s1505_s30, 512  ;;  %p1257_p13 = scmp.lt.s32.totalorder %s1505_s30, %s1505_s30 }
  0x3e   : > { %p1250_p7 = scmp.ne.s32.totalorder %s1505_s30, %s1249_s22  ;;  %p1258_p1 = scmp.lt.s32.totalorder %s1249_s22, %s1249_s22 }
  0x40   : > { %p1252_p8 = pnand %p1250_p7, %p1517_p0  ;;  %p1259_p6 = por %p1258_p1, %p1257_p13 }
  0x42   : > { %p1253_p11 = pneg %p1252_p8 }
  0x44   : > { %p1260_p9 = pnand %p1259_p6, %p1253_p11 }
  0x46   : > { %1263 = shalt.err (!%p1260_p9)
}
  0x47   : > { %1125 = dma.hbm_to_vmem [thread:$0]  (!%p1501_p12), %s1714_s1, 512, %s1505_s30, [#allocation3], %s1367_s17, %s1367_s17, %s1368_s14  }
  0x48   : > { %s1264_s19 = scalar_lea.hbm %s1716_s3, 1024 }
  0x49   : > { %p1265_p2 = scmp.ne.s32.totalorder %s1716_s3, %s1264_s19  ;;  %p1271_p7 = scmp.lt.u32.totalorder %s1264_s19, %s1716_s3 }
  0x4b   : > { %p1267_p3 = pnand %p1265_p2, %p1517_p0 }
  0x4d   : > { %p1268_p4 = pneg %p1267_p3 }
  0x4f   : > { %p1273_p8 = pnand %p1271_p7, %p1268_p4 }
  0x51   : > { %1276 = shalt.err (!%p1273_p8)
}
  0x52   : > { %s1277_s22 = scalar_lea.vmem %s376_s16, 1024  ;;  %p1285_p6 = scmp.lt.s32.totalorder %s376_s16, %s376_s16 }
  0x53   : > { %p1278_p11 = scmp.ne.s32.totalorder %s376_s16, %s1277_s22  ;;  %p1286_p9 = scmp.lt.s32.totalorder %s1277_s22, %s1277_s22 }
  0x55   : > { %p1280_p13 = pnand %p1278_p11, %p1517_p0  ;;  %p1287_p5 = por %p1286_p9, %p1285_p6 }
  0x57   : > { %p1281_p1 = pneg %p1280_p13 }
  0x59   : > { %p1288_p10 = pnand %p1287_p5, %p1281_p1 }
  0x5b   : > { %1291 = shalt.err (!%p1288_p10)
}
  0x5c   : > { %1131 = dma.hbm_to_vmem [thread:$0]  (!%p1501_p12), %s1716_s3, 1024, %s376_s16, [#allocation6], %s1367_s17, %s1367_s17, %s1368_s14  }
  0x5d   : > { %p1751_p2 = scmp.ne.s32.totalorder %s1748_s20, 0 }
  0x5e   : > { %p1752_p0 = scmp.eq.s32.totalorder (!%p1751_p2), %s1463_s29, 0 }
  0x5f   : > { %425 = sbr.rel (%p1751_p2) target bundleno = 1726 (0x6be), region = 72 }
  0x66   : > { %1337 = dma.done.wait (%p1752_p0), [#allocation3], 512   ;;  %p1753_p3 = pmov %p1752_p0 }
  0x67   : > { %p1754_p5 = pmov %p1752_p0 }
  0x68   : > { %1339 = vsyncadd (%p1753_p3), [#allocation3], 4294966784 }
  0x69   : > { %1341 = dma.done.wait (%p1754_p5), [#allocation6], 2048   ;;  %p1755_p10 = pmov %p1752_p0 }
  0x6a   : > { %v1369_v0 = vmov 0.0   ;;  %vm1370_vm0 = vmmov 0   ;;  %p476_p12 = scmp.lt.s32.totalorder %s1463_s29, 1  ;;  %v1182_v1 = vld [vmem:[#allocation2] sm:$0xff]   ;;  %v1183_v2 = vld [vmem:[#allocation2 + $0x8] sm:$0xff]   ;;  %v1184_v3 = vld [vmem:[#allocation2 + $0x10] sm:$0xff]   ;;  %v569_v14 = vlaneseq }
  0x6b   : > { %1343 = vsyncadd (%p1755_p10), [#allocation6], 4294965248  ;;  %1056 = vmatprep.subr.bf16.mxu0 %v1369_v0  ;;  %1064 = vmatprep.mubr.msk.bf16.mxu0 %vm1370_vm0, %v1369_v0  ;;  %vm521_vm1 = vcmask 523264   ;;  %v1185_v4 = vld [vmem:[#allocation2 + $0x18] sm:$0xff]   ;;  %v1186_v12 = vld [vmem:[#allocation5] sm:$0xff]   ;;  %s473_s23 = sand.u32 1, %s1354_s26  }
  0x6c   : > { %1068 = vmatprep.subr.bf16.mxu1 %v1369_v0  ;;  %1084 = vmatprep.mubr.msk.bf16.mxu1 %vm1370_vm0, %v1369_v0  ;;  %s477_s25 = scalar_select %p476_p12, %s1463_s29, 1  ;;  %v999_v6 = vld [vmem:[%s1717_s4] ss:$0 sm:$0xff]  ;;  %v1187_v13 = vld [vmem:[#allocation5 + $0x8] sm:$0xff]   ;;  %v1621_v15 = vand.u32 127, %v569_v14  ;;  %v1188_v21 = vld [vmem:[#allocation5 + $0x10] sm:$0xff]  }
  0x6d   : > { %1057 = vmatpush3.bf16.msra.mxu0 %v1182_v1  ;;  %1069 = vmatpush3.bf16.msra.mxu1 %v1186_v12  ;;  %v1189_v22 = vld [vmem:[#allocation5 + $0x18] sm:$0xff]   ;;  %v1190_v23 = vld [vmem:[#allocation5 + $0x20] sm:$0xff]   ;;  %v1191_v24 = vld [vmem:[#allocation5 + $0x28] sm:$0xff]   ;;  %s997_s16 = sshll.u32 %s473_s23, 3  ;;  %s1756_s12 = sld [smem:[#allocation18_spill]] }
  0x6e   : > { %1058 = vmatprep.subr.bf16.mxu0 %v1369_v0  ;;  %s998_s20 = sshll.u32 %s477_s25, 2  ;;  %1070 = vmatprep.subr.bf16.mxu1 %v1369_v0  ;;  %vm571_vm2 = vcmp.lt.s32.totalorder %v1621_v15, 32  ;;  %v1192_v25 = vld [vmem:[#allocation5 + $0x30] sm:$0xff]   ;;  %v1193_v26 = vld [vmem:[#allocation5 + $0x38] sm:$0xff]   ;;  %v1194_v45 = vld [vmem:[#allocation7] sm:$0xff]   ;;  %s1757_s19 = sld [smem:[#allocation19_spill]] }
  0x6f   : > { %s479_s17 = scalar_lea.vmem %s1713_s0, %s998_s20  ;;  %v1005_v31 = vld [vmem:[%s1720_s7] ss:$0 sm:$0xff]  ;;  %v1195_v46 = vld [vmem:[#allocation7 + $0x8] sm:$0xff]   ;;  %v1196_v52 = vld [vmem:[#allocation7 + $0x10] sm:$0xff]   ;;  %s1030_s21 = sshll.u32 %s1463_s29, 7 }
  0x70   : > { %v481_v5 = vld [vmem:[%s479_s17] sm:$0xf]  ;;  %v1198_v54 = vld [vmem:[#allocation7 + $0x20] sm:$0xff]   ;;  %v1199_v55 = vld [vmem:[#allocation7 + $0x28] sm:$0xff]   ;;  %s475_s24 = scalar_lea.vmem [#allocation8], %s997_s16  ;;  %s1758_s30 = sld [smem:[#allocation20_spill]] }
  0x71   : > { %1059 = vmatpush3.bf16.msra.mxu0 %v1183_v2  ;;  %1071 = vmatpush3.bf16.msra.mxu1 %v1187_v13  ;;  %v1006_v33 = vld [vmem:[%s1723_s10] ss:$0 sm:$0xff]  ;;  %v1200_v56 = vld [vmem:[#allocation7 + $0x30] sm:$0xff]   ;;  %s897_s15 = sshll.u32 %s475_s24, 4  ;;  %s884_s25 = scalar_lea.sflag [#allocation4], %s473_s23  ;;  %s1673_s15 = int_to_ptr.vmem [resolvable:$true] %s897_s15 }
  0x72   : > { %1060 = vmatprep.subr.bf16.mxu0 %v1369_v0  ;;  %1072 = vmatprep.subr.bf16.mxu1 %v1369_v0  ;;  %v1007_v39 = vld [vmem:[%s1718_s5] ss:$0 sm:$0xff]  ;;  %s1292_s20 = scalar_lea.vmem %s1673_s15, 128  ;;  %p1759_p7 = scmp.ne.s32.totalorder %s1745_s18, 0 }
  0x73   : > { %v1197_v53 = vld [vmem:[#allocation7 + $0x18] sm:$0xff]   ;;  %p1293_p4 = scmp.ne.s32.totalorder %s1673_s15, %s1292_s20  ;;  %s1371_s29 = smov [#allocation8]  }
  0x74   : > { %v1201_v57 = vld [vmem:[#allocation7 + $0x38] sm:$0xff]   ;;  %s1296_s16 = sshll.u32 %s1371_s29, 4  ;;  %s1297_s16 = int_to_ptr.vmem [resolvable:$false] %s1296_s16 }
  0x75   : > { %1061 = vmatpush3.bf16.msra.mxu0 %v1184_v3  ;;  %1073 = vmatpush3.bf16.msra.mxu1 %v1188_v21  ;;  %v1016_v62 = vld [vmem:[%s1721_s8] ss:$0 sm:$0xff]  ;;  %p1294_p8 = pnand %p1293_p4, %p1759_p7  ;;  %s1298_s17 = scalar_lea.vmem %s1297_s16, 256 }
  0x76   : > { %1062 = vmatprep.subr.bf16.mxu0 %v1369_v0  ;;  %1074 = vmatprep.subr.bf16.mxu1 %v1369_v0  ;;  %v1017_v1 = vld [vmem:[%s1724_s11] ss:$0 sm:$0xff]  ;;  %s1671_s9 = scalar_lea.hbm %s1758_s30, %s1030_s21  ;;  %p1299_p13 = scmp.lt.s32.totalorder %s1673_s15, %s1297_s16 }
  0x77   : > { %v1028_v15 = vld [vmem:[%s1757_s19] ss:$0 sm:$0xff]  ;;  %p1295_p11 = pneg %p1294_p8  ;;  %p1300_p1 = scmp.lt.s32.totalorder %s1298_s17, %s1292_s20 }
  0x79   : > { %1063 = vmatpush3.bf16.msra.mxu0 %v1185_v4  ;;  %1075 = vmatpush3.bf16.msra.mxu1 %v1189_v22  ;;  %v1027_v22 = vld [vmem:[%s1756_s12] ss:$0 sm:$0xff]  ;;  %p1301_p6 = por %p1300_p1, %p1299_p13 }
  0x7a   : > { %1088 = vmatprep.subr.bf16.mxu0 %v1369_v0  ;;  %1076 = vmatprep.subr.bf16.mxu1 %v1369_v0 }
  0x7b   : > { %p1302_p9 = pnand %p1301_p6, %p1295_p11 }
  0x7c   : > { %1065 = vmatmul.mubr.msk.bf16.vlgmr.msra.gmra.mrb[0].mxu0 %vm521_vm1, %v481_v5 }
  0x7d   : > { %1104 = vmatprep.mubr.msk.bf16.mxu0 %vm1370_vm0, %v1369_v0  ;;  %1077 = vmatpush3.bf16.msra.mxu1 %v1190_v23 }
  0x7e   : > { %1078 = vmatprep.subr.bf16.mxu1 %v1369_v0  ;;  %1089 = vmatpush3.bf16.msra.mxu0 %v1194_v45 }
  0x7f   : > { %1090 = vmatprep.subr.bf16.mxu0 %v1369_v0 }
  0x81   : > { %1079 = vmatpush3.bf16.msra.mxu1 %v1191_v24 }
  0x82   : > { %1080 = vmatprep.subr.bf16.mxu1 %v1369_v0  ;;  %1091 = vmatpush3.bf16.msra.mxu0 %v1195_v46 }
  0x83   : > { %1092 = vmatprep.subr.bf16.mxu0 %v1369_v0 }
  0x85   : > { %1081 = vmatpush3.bf16.msra.mxu1 %v1192_v25 }
  0x86   : > { %1082 = vmatprep.subr.bf16.mxu1 %v1369_v0  ;;  %1093 = vmatpush3.bf16.msra.mxu0 %v1196_v52 }
  0x87   : > { %1094 = vmatprep.subr.bf16.mxu0 %v1369_v0 }
  0x89   : > { %1083 = vmatpush3.bf16.msra.mxu1 %v1193_v26 }
  0x8a   : > { %1095 = vmatpush3.bf16.msra.mxu0 %v1197_v53 }
  0x8b   : > { %1096 = vmatprep.subr.bf16.mxu0 %v1369_v0 }
  0x8e   : > { %1097 = vmatpush3.bf16.msra.mxu0 %v1198_v54 }
  0x8f   : > { %1098 = vmatprep.subr.bf16.mxu0 %v1369_v0 }
  0x92   : > { %1099 = vmatpush3.bf16.msra.mxu0 %v1199_v55 }
  0x93   : > { %1100 = vmatprep.subr.bf16.mxu0 %v1369_v0 }
  0x96   : > { %1101 = vmatpush3.bf16.msra.mxu0 %v1200_v56 }
  0x97   : > { %1102 = vmatprep.subr.bf16.mxu0 %v1369_v0 }
  0x9a   : > { %1103 = vmatpush3.bf16.msra.mxu0 %v1201_v57 }
 0x14f   : > { %v559_v7 = vpop.f32.mrb[0].mxu0 }
 0x150   : > { %v560_v8 = vadd.f32 %v999_v6, %v559_v7  ;;  %v1066_v9 = vpop.f32.mrb[1].mxu0  ;;  %v1018_v6 = vld [vmem:[%s1719_s6] ss:$0 sm:$0xff] }
 0x151   : > { %v562_v10 = vpop.f32.mrb[2].mxu0 }
 0x152   : > { %565 = vadd.xlane.f32.xlu0 %v560_v8  ;;  %v1067_v11 = vpop.f32.mrb[3].mxu0 }
 0x1df   : > { %v566_v16 = vpop.xlane.xlu0 %565 }
 0x1e0   : > { %v567_v17 = vmul.f32 0.03125, %v566_v16 }
 0x1e2   : > { %v568_v18 = vsub.f32 %v560_v8, %v567_v17 }
 0x1e4   : > { %v572_v19 = vsel %vm571_vm2, %v568_v18, 0.0 }
 0x1e5   : > { %v573_v20 = vmul.f32 %v572_v19, %v572_v19 }
 0x1e7   : > { %574 = vadd.xlane.f32.xlu0 %v573_v20 }
 0x274   : > { %v575_v27 = vpop.xlane.xlu0 %574 }
 0x275   : > { %v576_v28 = vmul.f32 0.03125, %v575_v27 }
 0x277   : > { %v577_v29 = vadd.f32 1e-05, %v576_v28 }
 0x279   : > { %1202 = vrsqrt.f32 %v577_v29 }
 0x283   : > { %v1203_v30 = vpop.eup %1202 }
 0x284   : > { %v579_v32 = vmul.f32 %v1203_v30, %v572_v19 }
 0x286   : > { %v587_v34 = vmul.f32 %v1005_v31, %v579_v32 }
 0x288   : > { %v595_v35 = vadd.f32 %v1006_v33, %v587_v34 }
 0x28a   : > { %vm596_vm3 = vcmp.ge.f32.partialorder %v595_v35, 0.0  ;;  %v597_v36 = vmul.f32 0.01, %v595_v35 }
 0x28c   : > { %v598_v37 = vsel %vm596_vm3, %v595_v35, %v597_v36 }
 0x28d   : > { %v599_v38 = vpack.c.bf16 %v598_v37, %v598_v37 }
 0x28f   : > { %1085 = vmatmul.mubr.bf16.vlgmr.msra.gmra.mrb[0].mxu1 %v599_v38 }
 0x362   : > { %v705_v40 = vpop.f32.mrb[0].mxu1 }
 0x363   : > { %v706_v41 = vadd.f32 %v1007_v39, %v705_v40  ;;  %v1086_v42 = vpop.f32.mrb[1].mxu1 }
 0x364   : > { %v708_v43 = vpop.f32.mrb[2].mxu1 }
 0x365   : > { %711 = vadd.xlane.f32.xlu1 %v706_v41  ;;  %v1087_v44 = vpop.f32.mrb[3].mxu1 }
 0x3f2   : > { %v712_v47 = vpop.xlane.xlu1 %711 }
 0x3f3   : > { %v713_v48 = vmul.f32 0.03125, %v712_v47 }
 0x3f5   : > { %v714_v49 = vsub.f32 %v706_v41, %v713_v48 }
 0x3f7   : > { %v715_v50 = vsel %vm571_vm2, %v714_v49, 0.0 }
 0x3f8   : > { %v716_v51 = vmul.f32 %v715_v50, %v715_v50 }
 0x3fa   : > { %717 = vadd.xlane.f32.xlu1 %v716_v51 }
 0x487   : > { %v718_v58 = vpop.xlane.xlu1 %717 }
 0x488   : > { %v719_v59 = vmul.f32 0.03125, %v718_v58 }
 0x48a   : > { %v720_v60 = vadd.f32 1e-05, %v719_v59 }
 0x48c   : > { %1204 = vrsqrt.f32 %v720_v60 }
 0x496   : > { %v1205_v61 = vpop.eup %1204 }
 0x497   : > { %v722_v63 = vmul.f32 %v1205_v61, %v715_v50 }
 0x499   : > { %v730_v2 = vmul.f32 %v1016_v62, %v722_v63 }
 0x49b   : > { %v738_v3 = vadd.f32 %v1017_v1, %v730_v2 }
 0x49d   : > { %vm739_vm4 = vcmp.ge.f32.partialorder %v738_v3, 0.0  ;;  %v740_v4 = vmul.f32 0.01, %v738_v3 }
 0x49f   : > { %v741_v0 = vsel %vm739_vm4, %v738_v3, %v740_v4 }
 0x4a0   : > { %v742_v5 = vpack.c.bf16 %v741_v0, %v741_v0 }
 0x4a2   : > { %1105 = vmatmul.mubr.bf16.vlgmr.msra.gmra.mrb[4].mxu0 %v742_v5 }
 0x575   : > { %v848_v7 = vpop.f32.mrb[4].mxu0 }
 0x576   : > { %v849_v8 = vadd.f32 %v1018_v6, %v848_v7  ;;  %v1106_v9 = vpop.f32.mrb[5].mxu0 }
 0x577   : > { %v851_v10 = vpop.f32.mrb[6].mxu0 }
 0x578   : > { %854 = vadd.xlane.f32.xlu0 %v849_v8  ;;  %v1107_v11 = vpop.f32.mrb[7].mxu0 }
 0x605   : > { %v855_v12 = vpop.xlane.xlu0 %854 }
 0x606   : > { %v856_v13 = vmul.f32 0.03125, %v855_v12 }
 0x608   : > { %v857_v14 = vsub.f32 %v849_v8, %v856_v13 }
 0x60a   : > { %v858_v16 = vsel %vm571_vm2, %v857_v14, 0.0 }
 0x60b   : > { %v859_v17 = vmul.f32 %v858_v16, %v858_v16 }
 0x60d   : > { %860 = vadd.xlane.f32.xlu1 %v859_v17 }
 0x69a   : > { %v861_v18 = vpop.xlane.xlu1 %860 }
 0x69b   : > { %v862_v19 = vmul.f32 0.03125, %v861_v18 }
 0x69d   : > { %v863_v20 = vadd.f32 1e-05, %v862_v19 }
 0x69f   : > { %1206 = vrsqrt.f32 %v863_v20 }
 0x6a9   : > { %v1207_v21 = vpop.eup %1206 }
 0x6aa   : > { %v865_v23 = vmul.f32 %v1207_v21, %v858_v16 }
 0x6ac   : > { %v873_v24 = vmul.f32 %v1027_v22, %v865_v23 }
 0x6ae   : > { %v881_v25 = vadd.f32 %v1028_v15, %v873_v24 }
 0x6b0   : > { %882 = vst [vmem:[%s475_s24] sm:$0xff] %v881_v25 }
 0x6b1   : > { %1305 = shalt.err (!%p1302_p9)
}
 0x6b2   : > { %s1306_s23 = scalar_lea.hbm %s1671_s9, 128  ;;  %s1310_s13 = scalar_lea.hbm %s1758_s30, 256 }
 0x6b3   : > { %p1307_p2 = scmp.ne.s32.totalorder %s1671_s9, %s1306_s23  ;;  %p1311_p5 = scmp.lt.u32.totalorder %s1671_s9, %s1758_s30 }
 0x6b4   : > { %p1312_p10 = scmp.lt.u32.totalorder %s1310_s13, %s1306_s23  ;;  %p1314_p4 = scmp.lt.u32.totalorder %s1306_s23, %s1671_s9 }
 0x6b5   : > { %p1308_p0 = pnand %p1307_p2, %p1759_p7 }
 0x6b6   : > { %p1313_p12 = por %p1312_p10, %p1311_p5 }
 0x6b7   : > { %p1309_p3 = pneg %p1308_p0 }
 0x6b8   : > { %p1315_p8 = por %p1314_p4, %p1313_p12 }
 0x6ba   : > { %p1316_p11 = pnand %p1315_p8, %p1309_p3 }
 0x6bc   : > { %1319 = shalt.err (!%p1316_p11)
}
 0x6bd   : > { %1120 = dma.vmem_to_hbm [thread:$0]  (%p1759_p7), %s1673_s15, 128, %s1671_s9, %s884_s25  }
 0x6be PF: > { %s1760_s21 = sld [smem:[#allocation14_spill]]  ;;  %s1761_s24 = sld [smem:[#allocation12_spill]] }
 0x6bf   : > { %s1762_s27 = sld [smem:[#allocation17_spill]] }
 0x6c4   : > { %p1142_p13 = scmp.ge.s32.totalorder %s1760_s21, 2  ;;  %s909_s22 = sand.u32 1, %s1761_s24  }
 0x6c5   : > { %p1763_p1 = scmp.ne.s32.totalorder %s1762_s27, 0  ;;  %s910_s20 = scalar_lea.sflag [#allocation4], %s909_s22 }
 0x6c7   : > { %p1133_p6 = pnand %p1142_p13, %p1763_p1 }
 0x6c9   : > { %1345 = dma.done.wait (!%p1133_p6), %s910_s20, 128  }
 0x6ca   : > { %1347 = vsyncadd (!%p1133_p6), %s910_s20, 4294967168  ;;  %s1764_s28 = sld [smem:[#allocation15_spill]]  ;;  %s1765_s29 = sld [smem:[#allocation13_spill]] }
 0x6cb   : > { %s1766_s27 = sld [smem:[#allocation16_spill]]  ;;  %s1767_s25 = smov %s1354_s26 }
 0x6d0   : > { %p25_p9 = scmp.ge.s32.totalorder %s1764_s28, 4   ;;  %s1768_s26 = smov %s1765_s29 }
 0x6d2   :  { %27 = sbr.rel (!%p25_p9) target bundleno = 9 (0x9), region = 120 }
 0x6d9   :  { %915 = vsyncpa [#allocation3], 1 }
 0x6da   :  { %917 = vsyncpa [#allocation3 + $0x1], 1 }
 0x6db   :  { %918 = vsyncpa [#allocation6], 1 }
 0x6dc   :  { %919 = vsyncpa [#allocation4], 1 }
 0x6dd   :  { %921 = vsyncpa [#allocation4 + $0x1], 1 }

</bundles_post_ra>
